<compile_context>
chip_gen: v6e
topology: v6e:2x2x1
jax: 0.10.0
libtpu: 0.0.40
codegen_flags: <defaults>
</compile_context>

<pallas_src>
from math import sqrt

import jax
import jax.numpy as jnp
from jax.experimental import pallas as pl
from jax.experimental.pallas import tpu as pltpu

NEG_INF = -1000000000.0


def _gather_lens(len_ref, b0, bt):
    """(bt, 1, 1) int32 vector of sequence lengths for this batch block (SMEM scalar reads)."""
    biota = jax.lax.broadcasted_iota(jnp.int32, (bt, 1, 1), 0)
    lens = jnp.zeros((bt, 1, 1), jnp.int32)
    for j in range(bt):                      # bt is small and static -> a few vselects
        lens = jnp.where(biota == j, len_ref[b0 + j], lens)
    return lens


def _trilinear(X, Y, Yb, w):
    """U[b,m,k] = X[b,m].w0 + Y[b,k].w1 + (X[b,m]*Y[b,k]).w2  with X:[bt,M,d], Y:[bt,K,d], w:[3,d].

    MXU core runs with bf16 operands / f32 accumulation; the rank-1 bias terms stay on the VPU.
    """
    core = jnp.einsum('bmd,bkd->bmk',
                      (X * w[2:3, :]).astype(jnp.bfloat16), Yb,
                      preferred_element_type=jnp.float32)                 # [bt, M, K]
    rb = jnp.sum(X * w[0:1, :], axis=-1, keepdims=True)                   # [bt, M, 1]
    cb = jnp.sum(Y * w[1:2, :], axis=-1, keepdims=True)                   # [bt, K, 1]
    return core + rb + jnp.swapaxes(cb, 1, 2)


def _row_col_softmax(U):
    """Row softmax A (axis=-1) and column softmax C (axis=1, kept untransposed), sharing one exp.

    Matches PyTorch masked_fill(-1e9) + softmax, including the uniform distribution produced for
    fully-masked rows/columns (guard avoids 0/0).
    """
    m = U.shape[1]
    rmax = jnp.max(U, axis=2, keepdims=True)                              # [bt, M, 1]
    E = jnp.exp(U - rmax)                                                 # single full-size exp
    A = E * pl.reciprocal(jnp.sum(E, axis=2, keepdims=True), approx=True)
    gmax = jnp.max(rmax, axis=1, keepdims=True)                           # [bt, 1, 1]
    F = E * jnp.exp(rmax - gmax)                                          # == exp(U - gmax)
    csum = jnp.sum(F, axis=1, keepdims=True)                              # [bt, 1, K]
    C = jnp.where(csum > 0.0, F * pl.reciprocal(csum, approx=True), 1.0 / m)
    return A, C


def _read(P, V):
    """[bt,M,K] @ [bt,K,d] -> [bt,M,d]  (bf16 operands, f32 accumulation)."""
    return jnp.einsum('bmk,bkd->bmd', P, V, preferred_element_type=jnp.float32)


def _read_t(P, V):
    """P^T @ V for column-normalized P: [bt,M,K], V:[bt,M,d] -> [bt,K,d] (no explicit transpose)."""
    return jnp.einsum('bmk,bmd->bkd', P, V, preferred_element_type=jnp.float32)


def _store_cat(out_ref, parts, d):
    """Store 9 lane-aligned [bt, M, d] chunks into the (bt, M, 9d) output block."""
    for i, p in enumerate(parts):
        out_ref[:, :, pl.ds(i * d, d)] = p.astype(out_ref.dtype)


def triple_attention_kernel(lp_ref, lq_ref, la_ref,          # scalar prefetch (SMEM lengths)
                            ep_ref, eq_ref, ea_ref,           # activations [bt, *, d]
                            w_ref,                             # stacked similarity weights [9, d]
                            gp_ref, gq_ref, ga_ref):           # outputs [bt, *, 9d]
    bt, L, d = ep_ref.shape
    J, N = eq_ref.shape[1], ea_ref.shape[1]
    b0 = pl.program_id(0) * bt
    f32, bf16 = jnp.float32, jnp.bfloat16

    Ep = ep_ref[...].astype(f32)                             # [bt, L, d]
    Eq = eq_ref[...].astype(f32)                             # [bt, J, d]
    Ea = ea_ref[...].astype(f32)                             # [bt, N, d]
    Epb, Eqb, Eab = Ep.astype(bf16), Eq.astype(bf16), Ea.astype(bf16)
    W = w_ref[...].astype(f32)                               # [9, d]

    # Prefix masks rebuilt in-kernel from scalar-prefetched lengths (no mask DMA streams).
    lp = _gather_lens(lp_ref, b0, bt)
    lq = _gather_lens(lq_ref, b0, bt)
    la = _gather_lens(la_ref, b0, bt)
    vp_r = jax.lax.broadcasted_iota(jnp.int32, (bt, L, 1), 1) < lp
    vq_r = jax.lax.broadcasted_iota(jnp.int32, (bt, J, 1), 1) < lq
    vq_c = jax.lax.broadcasted_iota(jnp.int32, (bt, 1, J), 2) < lq
    va_c = jax.lax.broadcasted_iota(jnp.int32, (bt, 1, N), 2) < la

    # Pairwise trilinear similarities (decomposed; no [M, K, d] tensor), masked like masked_fill.
    Upq = jnp.where(vp_r & vq_c, _trilinear(Ep, Eq, Eqb, W[0:3]), NEG_INF)   # [bt, L, J]
    Upa = jnp.where(vp_r & va_c, _trilinear(Ep, Ea, Eab, W[3:6]), NEG_INF)   # [bt, L, N]
    Uqa = jnp.where(vq_r & va_c, _trilinear(Eq, Ea, Eab, W[6:9]), NEG_INF)   # [bt, J, N]

    # Row softmax A* and column softmax C* (C* is B*^T kept untransposed).
    Apq, Cpq = _row_col_softmax(Upq)
    Apa, Cpa = _row_col_softmax(Upa)
    Aqa, Cqa = _row_col_softmax(Uqa)
    Apqb, Cpqb = Apq.astype(bf16), Cpq.astype(bf16)
    Apab, Cpab = Apa.astype(bf16), Cpa.astype(bf16)
    Aqab, Cqab = Aqa.astype(bf16), Cqa.astype(bf16)

    # First-order attention reads.
    Apq_bar = _read(Apqb, Eqb)                               # [bt, L, d]
    Bpq_bar = _read_t(Cpqb, Epb)                             # [bt, J, d]
    Apa_bar = _read(Apab, Eab)                               # [bt, L, d]
    Bpa_bar = _read_t(Cpab, Epb)                             # [bt, N, d]
    Aqa_bar = _read(Aqab, Eab)                               # [bt, J, d]
    Bqa_bar = _read_t(Cqab, Eqb)                             # [bt, N, d]

    Apq_bb, Bpq_bb = Apq_bar.astype(bf16), Bpq_bar.astype(bf16)
    Apa_bb, Bpa_bb = Apa_bar.astype(bf16), Bpa_bar.astype(bf16)
    Aqa_bb, Bqa_bb = Aqa_bar.astype(bf16), Bqa_bar.astype(bf16)

    _store_cat(gp_ref,
               [Ep, Apq_bar, Apa_bar, Ep * Apq_bar, Ep * Apa_bar,
                _read(Apqb, Bpq_bb), _read(Apqb, Aqa_bb),
                _read(Apab, Bpa_bb), _read(Apab, Bqa_bb)], d)
    _store_cat(gq_ref,
               [Eq, Bpq_bar, Aqa_bar, Eq * Bpq_bar, Eq * Aqa_bar,
                _read_t(Cpqb, Apq_bb), _read_t(Cpqb, Apa_bb),
                _read(Aqab, Bpa_bb), _read(Aqab, Bqa_bb)], d)
    _store_cat(ga_ref,
               [Ea, Bpa_bar, Bqa_bar, Ea * Bpa_bar, Ea * Bqa_bar,
                _read_t(Cpab, Apq_bb), _read_t(Cpab, Apa_bb),
                _read_t(Cqab, Bpq_bb), _read_t(Cqab, Aqa_bb)], d)


def _pick_block_b(bs):
    """Largest batch block that still leaves >= 4 grid steps (>= 2 per v7x core); else largest divisor."""
    for bt in (8, 4, 2):
        if bs % bt == 0 and bs // bt >= 4:
            return bt
    for bt in (8, 4, 2):
        if bs % bt == 0:
            return bt
    return 1


def triple_attention(Ep, Eq, Ea, len_p, len_q, len_a, w_stacked,
                     *, block_b=None, out_dtype=jnp.float32):
    """TripleAttention forward.

    Args:
      Ep/Eq/Ea: [bs, L/J/N, d] activations.
      len_*:    [bs] int32 prefix lengths (mask_x[b, m] = m < len_x[b]).
      w_stacked:[9, d] = the three PyTorch Linear(3d, 1, bias=False) weights, each [1, 3d]
                reshaped to [3, d] (rows: w_x, w_y, w_xy) and stacked: [Wpq; Wpa; Wqa].
      out_dtype: set to jnp.bfloat16 to halve the (dominant, 9x) output HBM writeback if the
                consumer accepts bf16; default f32 preserves the module's output dtype.
    """
    bs, L, d = Ep.shape
    J, N = Eq.shape[1], Ea.shape[1]
    bt = _pick_block_b(bs) if block_b is None else block_b
    assert bs % bt == 0, "batch must be divisible by the batch block"
    grid = (bs // bt,)

    bmap = lambda i, lp, lq, la: (i, 0, 0)
    wmap = lambda i, lp, lq, la: (0, 0)

    grid_spec = pltpu.PrefetchScalarGridSpec(
        num_scalar_prefetch=3,                     # len_p, len_q, len_a -> SMEM
        grid=grid,
        in_specs=[
            pl.BlockSpec((bt, L, d), bmap),        # Ep
            pl.BlockSpec((bt, J, d), bmap),        # Eq
            pl.BlockSpec((bt, N, d), bmap),        # Ea
            pl.BlockSpec((9, d), wmap),            # stacked similarity weights
        ],
        out_specs=[
            pl.BlockSpec((bt, L, 9 * d), bmap),
            pl.BlockSpec((bt, J, 9 * d), bmap),
            pl.BlockSpec((bt, N, 9 * d), bmap),
        ],
    )

    out_shape = (
        jax.ShapeDtypeStruct((bs, L, 9 * d), out_dtype),   # Gp
        jax.ShapeDtypeStruct((bs, J, 9 * d), out_dtype),   # Gq
        jax.ShapeDtypeStruct((bs, N, 9 * d), out_dtype),   # Ga
    )

    # Advisory cost estimate: 7 MXU matmuls of 2*M*K*d flops per sequence pair, one shared exp
    # per score element, output bytes dominate (9x input).
    pairs = L * J + L * N + J * N
    in_bytes = bs * (L + J + N) * d * Ep.dtype.itemsize + 9 * d * w_stacked.dtype.itemsize
    out_bytes = bs * (L + J + N) * 9 * d * jnp.dtype(out_dtype).itemsize
    cost = pl.CostEstimate(flops=14 * bs * d * pairs,
                           transcendentals=bs * (pairs + 2 * (L + J + N)),
                           bytes_accessed=in_bytes + out_bytes)

    # Rough per-step VMEM footprint (double-buffered IO blocks + f32 intermediates); only raise
    # the scoped-VMEM limit above the 32 MiB default when the working set actually needs it.
    io_bytes = 2 * bt * (L + J + N) * d * (Ep.dtype.itemsize + 9 * jnp.dtype(out_dtype).itemsize)
    live_bytes = bt * (6 * pairs + 16 * (L + J + N) * d) * 4
    vmem_est = io_bytes + live_bytes
    vmem_limit = None if vmem_est < 28 * 1024 * 1024 else min(2 * vmem_est, 100 * 1024 * 1024)

    return pl.pallas_call(
        triple_attention_kernel,
        out_shape=out_shape,
        grid_spec=grid_spec,
        compiler_params=pltpu.CompilerParams(
            dimension_semantics=("parallel",),
            vmem_limit_bytes=vmem_limit),
        cost_estimate=cost,
    )(len_p, len_q, len_a, Ep, Eq, Ea, w_stacked)


def reference_forward(Ep, Eq, Ea, mask_p, mask_q, mask_a, Wpq, Wpa, Wqa):
    """Pure-JAX (f32) mirror of the PyTorch TripleAttention.forward (weights in [1, 3d] layout)."""
    d = Ep.shape[-1]

    def sim(X, Y, W):
        bs, M, _ = X.shape
        K = Y.shape[1]
        Xe = jnp.broadcast_to(X[:, :, None, :], (bs, M, K, d))
        Ye = jnp.broadcast_to(Y[:, None, :, :], (bs, M, K, d))
        cat = jnp.concatenate([Xe, Ye, Xe * Ye], axis=-1)
        return jnp.einsum('bmkc,c->bmk', cat, W[0])

    Upq = jnp.where(mask_p * jnp.swapaxes(mask_q, 1, 2) == 0, NEG_INF, sim(Ep, Eq, Wpq))
    Upa = jnp.where(mask_p * jnp.swapaxes(mask_a, 1, 2) == 0, NEG_INF, sim(Ep, Ea, Wpa))
    Uqa = jnp.where(mask_q * jnp.swapaxes(mask_a, 1, 2) == 0, NEG_INF, sim(Eq, Ea, Wqa))

    Apq = jax.nn.softmax(Upq, axis=2)
    Bpq = jnp.swapaxes(jax.nn.softmax(Upq, axis=1), 1, 2)
    Apa = jax.nn.softmax(Upa, axis=2)
    Bpa = jnp.swapaxes(jax.nn.softmax(Upa, axis=1), 1, 2)
    Aqa = jax.nn.softmax(Uqa, axis=2)
    Bqa = jnp.swapaxes(jax.nn.softmax(Uqa, axis=1), 1, 2)

    Apq_bar = Apq @ Eq
    Bpq_bar = Bpq @ Ep
    Apa_bar = Apa @ Ea
    Bpa_bar = Bpa @ Ep
    Aqa_bar = Aqa @ Ea
    Bqa_bar = Bqa @ Eq

    Gp = jnp.concatenate([Ep, Apq_bar, Apa_bar, Ep * Apq_bar, Ep * Apa_bar,
                          Apq @ Bpq_bar, Apq @ Aqa_bar, Apa @ Bpa_bar, Apa @ Bqa_bar], axis=-1)
    Gq = jnp.concatenate([Eq, Bpq_bar, Aqa_bar, Eq * Bpq_bar, Eq * Aqa_bar,
                          Bpq @ Apq_bar, Bpq @ Apa_bar, Aqa @ Bpa_bar, Aqa @ Bqa_bar], axis=-1)
    Ga = jnp.concatenate([Ea, Bpa_bar, Bqa_bar, Ea * Bpa_bar, Ea * Bqa_bar,
                          Bpa @ Apq_bar, Bpa @ Apa_bar, Bqa @ Bpq_bar, Bqa @ Aqa_bar], axis=-1)
    return Gp, Gq, Ga


if __name__ == "__main__":
    # bs=8 with batch block 2 -> 4 grid steps (>= 2 per v7x TensorCore); d lane-dense (128).
    bs, L, J, N, d_model = 8, 16, 8, 8, 128

    key = jax.random.PRNGKey(0)
    kp, kq, ka, k1, k2, k3 = jax.random.split(key, 6)

    scale = 0.5
    Ep = scale * jax.random.normal(kp, (bs, L, d_model), jnp.float32)
    Eq = scale * jax.random.normal(kq, (bs, J, d_model), jnp.float32)
    Ea = scale * jax.random.normal(ka, (bs, N, d_model), jnp.float32)

    len_p = jnp.array([12, 16, 5, 9, 1, 16, 7, 13], dtype=jnp.int32)
    len_q = jnp.array([8, 5, 3, 8, 2, 6, 8, 1], dtype=jnp.int32)
    len_a = jnp.array([6, 8, 4, 2, 8, 5, 3, 7], dtype=jnp.int32)

    # PyTorch Linear(3*d_model, 1, bias=False) weights, layout [out=1, in=3d].
    lim = 1.0 / sqrt(3 * d_model)
    Wpq = jax.random.uniform(k1, (1, 3 * d_model), jnp.float32, -lim, lim)
    Wpa = jax.random.uniform(k2, (1, 3 * d_model), jnp.float32, -lim, lim)
    Wqa = jax.random.uniform(k3, (1, 3 * d_model), jnp.float32, -lim, lim)
    w_stacked = jnp.concatenate(
        [Wpq.reshape(3, d_model), Wpa.reshape(3, d_model), Wqa.reshape(3, d_model)], axis=0)

    Gp, Gq, Ga = triple_attention(Ep, Eq, Ea, len_p, len_q, len_a, w_stacked)
    jax.block_until_ready((Gp, Gq, Ga))

    # Boolean/int masks only needed for the pure-JAX reference (kernel rebuilds them from lengths).
    mask_p = (jnp.arange(L)[None, :] < len_p[:, None]).astype(jnp.int32)[..., None]
    mask_q = (jnp.arange(J)[None, :] < len_q[:, None]).astype(jnp.int32)[..., None]
    mask_a = (jnp.arange(N)[None, :] < len_a[:, None]).astype(jnp.int32)[..., None]
    Gp_r, Gq_r, Ga_r = reference_forward(Ep, Eq, Ea, mask_p, mask_q, mask_a, Wpq, Wpa, Wqa)

    assert Gp.shape == (bs, L, 9 * d_model)
    assert Gq.shape == (bs, J, 9 * d_model)
    assert Ga.shape == (bs, N, 9 * d_model)
    # Tolerance accounts for bf16 MXU operands (f32 accumulation) and the approximate EUP
    # reciprocal in the softmax normalization; the reference is pure f32.
    assert jnp.allclose(Gp, Gp_r, atol=2e-2, rtol=2e-2)
    assert jnp.allclose(Gq, Gq_r, atol=2e-2, rtol=2e-2)
    assert jnp.allclose(Ga, Ga_r, atol=2e-2, rtol=2e-2)

    print("KERNEL_OK")
</pallas_src>

<mosaic_0001>
module attributes {stable_mosaic.version = 11 : i64} {
  func.func @triple_attention_kernel(%arg0: i32, %arg1: memref<8xi32, #tpu.memory_space<smem>>, %arg2: memref<8xi32, #tpu.memory_space<smem>>, %arg3: memref<8xi32, #tpu.memory_space<smem>>, %arg4: memref<2x16x128xf32, #tpu.memory_space<vmem>>, %arg5: memref<2x8x128xf32, #tpu.memory_space<vmem>>, %arg6: memref<2x8x128xf32, #tpu.memory_space<vmem>>, %arg7: memref<9x128xf32, #tpu.memory_space<vmem>>, %arg8: memref<2x16x1152xf32, #tpu.memory_space<vmem>>, %arg9: memref<2x8x1152xf32, #tpu.memory_space<vmem>>, %arg10: memref<2x8x1152xf32, #tpu.memory_space<vmem>>) attributes {dimension_semantics = [#tpu.dimension_semantics<parallel>], iteration_bounds = array<i64: 4>, scalar_prefetch = 3 : i64, scratch_operands = 0 : i64, tpu.core_type = #tpu.core_type<tc>, window_params = [{transform_indices = @transform_0, window_bounds = array<i64: 2, 16, 128>}, {transform_indices = @transform_1, window_bounds = array<i64: 2, 8, 128>}, {transform_indices = @transform_2, window_bounds = array<i64: 2, 8, 128>}, {pipeline_mode = #tpu.pipeline_mode<synchronous>, transform_indices = @transform_3, window_bounds = array<i64: 9, 128>}, {transform_indices = @transform_4, window_bounds = array<i64: 2, 16, 1152>}, {transform_indices = @transform_5, window_bounds = array<i64: 2, 8, 1152>}, {transform_indices = @transform_6, window_bounds = array<i64: 2, 8, 1152>}]} {
    %c2_i32 = arith.constant 2 : i32
    %0 = arith.muli %arg0, %c2_i32 : i32
    %c0 = arith.constant 0 : index
    %c0_0 = arith.constant 0 : index
    %c0_1 = arith.constant 0 : index
    %1 = vector.load %arg4[%c0, %c0_0, %c0_1] : memref<2x16x128xf32, #tpu.memory_space<vmem>>, vector<2x16x128xf32>
    %c0_2 = arith.constant 0 : index
    %c0_3 = arith.constant 0 : index
    %c0_4 = arith.constant 0 : index
    %2 = vector.load %arg5[%c0_2, %c0_3, %c0_4] : memref<2x8x128xf32, #tpu.memory_space<vmem>>, vector<2x8x128xf32>
    %c0_5 = arith.constant 0 : index
    %c0_6 = arith.constant 0 : index
    %c0_7 = arith.constant 0 : index
    %3 = vector.load %arg6[%c0_5, %c0_6, %c0_7] : memref<2x8x128xf32, #tpu.memory_space<vmem>>, vector<2x8x128xf32>
    %4 = arith.truncf %1 : vector<2x16x128xf32> to vector<2x16x128xbf16>
    %5 = arith.truncf %2 : vector<2x8x128xf32> to vector<2x8x128xbf16>
    %6 = arith.truncf %3 : vector<2x8x128xf32> to vector<2x8x128xbf16>
    %c0_8 = arith.constant 0 : index
    %c0_9 = arith.constant 0 : index
    %7 = vector.load %arg7[%c0_8, %c0_9] : memref<9x128xf32, #tpu.memory_space<vmem>>, vector<9x128xf32>
    %8 = tpu.iota {dimensions = array<i32: 0>} : vector<2x1x1xi32>
    %c0_i32 = arith.constant 0 : i32
    %9 = vector.broadcast %c0_i32 : i32 to vector<2x1x1xi32>
    %c0_i32_10 = arith.constant 0 : i32
    %10 = vector.broadcast %c0_i32_10 : i32 to vector<2x1x1xi32>
    %11 = arith.cmpi eq, %8, %10 : vector<2x1x1xi32>
    %c0_i32_11 = arith.constant 0 : i32
    %12 = arith.addi %0, %c0_i32_11 : i32
    %13 = arith.index_cast %12 : i32 to index
    %14 = memref.load %arg1[%13] : memref<8xi32, #tpu.memory_space<smem>>
    %15 = vector.broadcast %14 : i32 to vector<2x1x1xi32>
    %16 = arith.select %11, %15, %9 : vector<2x1x1xi1>, vector<2x1x1xi32>
    %c1_i32 = arith.constant 1 : i32
    %17 = vector.broadcast %c1_i32 : i32 to vector<2x1x1xi32>
    %18 = arith.cmpi eq, %8, %17 : vector<2x1x1xi32>
    %c1_i32_12 = arith.constant 1 : i32
    %19 = arith.addi %0, %c1_i32_12 : i32
    %20 = arith.index_cast %19 : i32 to index
    %21 = memref.load %arg1[%20] : memref<8xi32, #tpu.memory_space<smem>>
    %22 = vector.broadcast %21 : i32 to vector<2x1x1xi32>
    %23 = arith.select %18, %22, %16 : vector<2x1x1xi1>, vector<2x1x1xi32>
    %24 = tpu.iota {dimensions = array<i32: 0>} : vector<2x1x1xi32>
    %c0_i32_13 = arith.constant 0 : i32
    %25 = vector.broadcast %c0_i32_13 : i32 to vector<2x1x1xi32>
    %c0_i32_14 = arith.constant 0 : i32
    %26 = vector.broadcast %c0_i32_14 : i32 to vector<2x1x1xi32>
    %27 = arith.cmpi eq, %24, %26 : vector<2x1x1xi32>
    %c0_i32_15 = arith.constant 0 : i32
    %28 = arith.addi %0, %c0_i32_15 : i32
    %29 = arith.index_cast %28 : i32 to index
    %30 = memref.load %arg2[%29] : memref<8xi32, #tpu.memory_space<smem>>
    %31 = vector.broadcast %30 : i32 to vector<2x1x1xi32>
    %32 = arith.select %27, %31, %25 : vector<2x1x1xi1>, vector<2x1x1xi32>
    %c1_i32_16 = arith.constant 1 : i32
    %33 = vector.broadcast %c1_i32_16 : i32 to vector<2x1x1xi32>
    %34 = arith.cmpi eq, %24, %33 : vector<2x1x1xi32>
    %c1_i32_17 = arith.constant 1 : i32
    %35 = arith.addi %0, %c1_i32_17 : i32
    %36 = arith.index_cast %35 : i32 to index
    %37 = memref.load %arg2[%36] : memref<8xi32, #tpu.memory_space<smem>>
    %38 = vector.broadcast %37 : i32 to vector<2x1x1xi32>
    %39 = arith.select %34, %38, %32 : vector<2x1x1xi1>, vector<2x1x1xi32>
    %40 = tpu.iota {dimensions = array<i32: 0>} : vector<2x1x1xi32>
    %c0_i32_18 = arith.constant 0 : i32
    %41 = vector.broadcast %c0_i32_18 : i32 to vector<2x1x1xi32>
    %c0_i32_19 = arith.constant 0 : i32
    %42 = vector.broadcast %c0_i32_19 : i32 to vector<2x1x1xi32>
    %43 = arith.cmpi eq, %40, %42 : vector<2x1x1xi32>
    %c0_i32_20 = arith.constant 0 : i32
    %44 = arith.addi %0, %c0_i32_20 : i32
    %45 = arith.index_cast %44 : i32 to index
    %46 = memref.load %arg3[%45] : memref<8xi32, #tpu.memory_space<smem>>
    %47 = vector.broadcast %46 : i32 to vector<2x1x1xi32>
    %48 = arith.select %43, %47, %41 : vector<2x1x1xi1>, vector<2x1x1xi32>
    %c1_i32_21 = arith.constant 1 : i32
    %49 = vector.broadcast %c1_i32_21 : i32 to vector<2x1x1xi32>
    %50 = arith.cmpi eq, %40, %49 : vector<2x1x1xi32>
    %c1_i32_22 = arith.constant 1 : i32
    %51 = arith.addi %0, %c1_i32_22 : i32
    %52 = arith.index_cast %51 : i32 to index
    %53 = memref.load %arg3[%52] : memref<8xi32, #tpu.memory_space<smem>>
    %54 = vector.broadcast %53 : i32 to vector<2x1x1xi32>
    %55 = arith.select %50, %54, %48 : vector<2x1x1xi1>, vector<2x1x1xi32>
    %56 = tpu.iota {dimensions = array<i32: 1>} : vector<2x16x1xi32>
    %57 = vector.broadcast %23 : vector<2x1x1xi32> to vector<2x16x1xi32>
    %58 = arith.cmpi slt, %56, %57 : vector<2x16x1xi32>
    %59 = tpu.iota {dimensions = array<i32: 1>} : vector<2x8x1xi32>
    %60 = vector.broadcast %39 : vector<2x1x1xi32> to vector<2x8x1xi32>
    %61 = arith.cmpi slt, %59, %60 : vector<2x8x1xi32>
    %62 = tpu.iota {dimensions = array<i32: 2>} : vector<2x1x8xi32>
    %63 = vector.broadcast %39 : vector<2x1x1xi32> to vector<2x1x8xi32>
    %64 = arith.cmpi slt, %62, %63 : vector<2x1x8xi32>
    %65 = tpu.iota {dimensions = array<i32: 2>} : vector<2x1x8xi32>
    %66 = vector.broadcast %55 : vector<2x1x1xi32> to vector<2x1x8xi32>
    %67 = arith.cmpi slt, %65, %66 : vector<2x1x8xi32>
    %68 = vector.broadcast %58 : vector<2x16x1xi1> to vector<2x16x8xi1>
    %69 = vector.broadcast %64 : vector<2x1x8xi1> to vector<2x16x8xi1>
    %70 = arith.andi %68, %69 : vector<2x16x8xi1>
    %71 = vector.extract_strided_slice %7 {offsets = [0, 0], sizes = [3, 128], strides = [1, 1]} : vector<9x128xf32> to vector<3x128xf32>
    %72 = vector.extract_strided_slice %71 {offsets = [2, 0], sizes = [1, 128], strides = [1, 1]} : vector<3x128xf32> to vector<1x128xf32>
    %73 = vector.shape_cast %72 : vector<1x128xf32> to vector<1x1x128xf32>
    %74 = vector.broadcast %73 : vector<1x1x128xf32> to vector<2x16x128xf32>
    %75 = arith.mulf %1, %74 : vector<2x16x128xf32>
    %76 = arith.truncf %75 : vector<2x16x128xf32> to vector<2x16x128xbf16>
    "tpu.trace_start"() <{level = 10 : i32, message = "bmd,bkd->bmk"}> : () -> ()
    %cst = arith.constant dense<0.000000e+00> : vector<2x16x8xf32>
    %77 = tpu.matmul %76, %5, %cst {dimension_numbers = #tpu.dot_dimension_numbers<[2], [2], [1], [1], [0, 0, 0, 1, 1, 1], [0], [0]>} : vector<2x16x128xbf16>, vector<2x8x128xbf16>, vector<2x16x8xf32> -> vector<2x16x8xf32>
    "tpu.trace_stop"() : () -> ()
    %78 = vector.extract_strided_slice %71 {offsets = [0, 0], sizes = [1, 128], strides = [1, 1]} : vector<3x128xf32> to vector<1x128xf32>
    %79 = vector.shape_cast %78 : vector<1x128xf32> to vector<1x1x128xf32>
    %80 = vector.broadcast %79 : vector<1x1x128xf32> to vector<2x16x128xf32>
    %81 = arith.mulf %1, %80 : vector<2x16x128xf32>
    %cst_23 = arith.constant dense<0.000000e+00> : vector<2x16xf32>
    %82 = vector.multi_reduction <add>, %81, %cst_23 [2] : vector<2x16x128xf32> to vector<2x16xf32>
    %83 = vector.shape_cast %82 : vector<2x16xf32> to vector<2x16x1xf32>
    %84 = vector.extract_strided_slice %71 {offsets = [1, 0], sizes = [1, 128], strides = [1, 1]} : vector<3x128xf32> to vector<1x128xf32>
    %85 = vector.shape_cast %84 : vector<1x128xf32> to vector<1x1x128xf32>
    %86 = vector.broadcast %85 : vector<1x1x128xf32> to vector<2x8x128xf32>
    %87 = arith.mulf %2, %86 : vector<2x8x128xf32>
    %cst_24 = arith.constant dense<0.000000e+00> : vector<2x8xf32>
    %88 = vector.multi_reduction <add>, %87, %cst_24 [2] : vector<2x8x128xf32> to vector<2x8xf32>
    %89 = vector.shape_cast %88 : vector<2x8xf32> to vector<2x8x1xf32>
    %90 = vector.broadcast %83 : vector<2x16x1xf32> to vector<2x16x8xf32>
    %91 = arith.addf %77, %90 : vector<2x16x8xf32>
    %92 = tpu.transpose %89, [0, 2, 1] : vector<2x8x1xf32> -> vector<2x1x8xf32>
    %93 = vector.broadcast %92 : vector<2x1x8xf32> to vector<2x16x8xf32>
    %94 = arith.addf %91, %93 : vector<2x16x8xf32>
    %cst_25 = arith.constant -1.000000e+09 : f32
    %95 = vector.broadcast %cst_25 : f32 to vector<2x16x8xf32>
    %96 = arith.select %70, %94, %95 : vector<2x16x8xi1>, vector<2x16x8xf32>
    %97 = vector.broadcast %58 : vector<2x16x1xi1> to vector<2x16x8xi1>
    %98 = vector.broadcast %67 : vector<2x1x8xi1> to vector<2x16x8xi1>
    %99 = arith.andi %97, %98 : vector<2x16x8xi1>
    %100 = vector.extract_strided_slice %7 {offsets = [3, 0], sizes = [3, 128], strides = [1, 1]} : vector<9x128xf32> to vector<3x128xf32>
    %101 = vector.extract_strided_slice %100 {offsets = [2, 0], sizes = [1, 128], strides = [1, 1]} : vector<3x128xf32> to vector<1x128xf32>
    %102 = vector.shape_cast %101 : vector<1x128xf32> to vector<1x1x128xf32>
    %103 = vector.broadcast %102 : vector<1x1x128xf32> to vector<2x16x128xf32>
    %104 = arith.mulf %1, %103 : vector<2x16x128xf32>
    %105 = arith.truncf %104 : vector<2x16x128xf32> to vector<2x16x128xbf16>
    "tpu.trace_start"() <{level = 10 : i32, message = "bmd,bkd->bmk"}> : () -> ()
    %cst_26 = arith.constant dense<0.000000e+00> : vector<2x16x8xf32>
    %106 = tpu.matmul %105, %6, %cst_26 {dimension_numbers = #tpu.dot_dimension_numbers<[2], [2], [1], [1], [0, 0, 0, 1, 1, 1], [0], [0]>} : vector<2x16x128xbf16>, vector<2x8x128xbf16>, vector<2x16x8xf32> -> vector<2x16x8xf32>
    "tpu.trace_stop"() : () -> ()
    %107 = vector.extract_strided_slice %100 {offsets = [0, 0], sizes = [1, 128], strides = [1, 1]} : vector<3x128xf32> to vector<1x128xf32>
    %108 = vector.shape_cast %107 : vector<1x128xf32> to vector<1x1x128xf32>
    %109 = vector.broadcast %108 : vector<1x1x128xf32> to vector<2x16x128xf32>
    %110 = arith.mulf %1, %109 : vector<2x16x128xf32>
    %cst_27 = arith.constant dense<0.000000e+00> : vector<2x16xf32>
    %111 = vector.multi_reduction <add>, %110, %cst_27 [2] : vector<2x16x128xf32> to vector<2x16xf32>
    %112 = vector.shape_cast %111 : vector<2x16xf32> to vector<2x16x1xf32>
    %113 = vector.extract_strided_slice %100 {offsets = [1, 0], sizes = [1, 128], strides = [1, 1]} : vector<3x128xf32> to vector<1x128xf32>
    %114 = vector.shape_cast %113 : vector<1x128xf32> to vector<1x1x128xf32>
    %115 = vector.broadcast %114 : vector<1x1x128xf32> to vector<2x8x128xf32>
    %116 = arith.mulf %3, %115 : vector<2x8x128xf32>
    %cst_28 = arith.constant dense<0.000000e+00> : vector<2x8xf32>
    %117 = vector.multi_reduction <add>, %116, %cst_28 [2] : vector<2x8x128xf32> to vector<2x8xf32>
    %118 = vector.shape_cast %117 : vector<2x8xf32> to vector<2x8x1xf32>
    %119 = vector.broadcast %112 : vector<2x16x1xf32> to vector<2x16x8xf32>
    %120 = arith.addf %106, %119 : vector<2x16x8xf32>
    %121 = tpu.transpose %118, [0, 2, 1] : vector<2x8x1xf32> -> vector<2x1x8xf32>
    %122 = vector.broadcast %121 : vector<2x1x8xf32> to vector<2x16x8xf32>
    %123 = arith.addf %120, %122 : vector<2x16x8xf32>
    %cst_29 = arith.constant -1.000000e+09 : f32
    %124 = vector.broadcast %cst_29 : f32 to vector<2x16x8xf32>
    %125 = arith.select %99, %123, %124 : vector<2x16x8xi1>, vector<2x16x8xf32>
    %126 = vector.broadcast %61 : vector<2x8x1xi1> to vector<2x8x8xi1>
    %127 = vector.broadcast %67 : vector<2x1x8xi1> to vector<2x8x8xi1>
    %128 = arith.andi %126, %127 : vector<2x8x8xi1>
    %129 = vector.extract_strided_slice %7 {offsets = [6, 0], sizes = [3, 128], strides = [1, 1]} : vector<9x128xf32> to vector<3x128xf32>
    %130 = vector.extract_strided_slice %129 {offsets = [2, 0], sizes = [1, 128], strides = [1, 1]} : vector<3x128xf32> to vector<1x128xf32>
    %131 = vector.shape_cast %130 : vector<1x128xf32> to vector<1x1x128xf32>
    %132 = vector.broadcast %131 : vector<1x1x128xf32> to vector<2x8x128xf32>
    %133 = arith.mulf %2, %132 : vector<2x8x128xf32>
    %134 = arith.truncf %133 : vector<2x8x128xf32> to vector<2x8x128xbf16>
    "tpu.trace_start"() <{level = 10 : i32, message = "bmd,bkd->bmk"}> : () -> ()
    %cst_30 = arith.constant dense<0.000000e+00> : vector<2x8x8xf32>
    %135 = tpu.matmul %134, %6, %cst_30 {dimension_numbers = #tpu.dot_dimension_numbers<[2], [2], [1], [1], [0, 0, 0, 1, 1, 1], [0], [0]>} : vector<2x8x128xbf16>, vector<2x8x128xbf16>, vector<2x8x8xf32> -> vector<2x8x8xf32>
    "tpu.trace_stop"() : () -> ()
    %136 = vector.extract_strided_slice %129 {offsets = [0, 0], sizes = [1, 128], strides = [1, 1]} : vector<3x128xf32> to vector<1x128xf32>
    %137 = vector.shape_cast %136 : vector<1x128xf32> to vector<1x1x128xf32>
    %138 = vector.broadcast %137 : vector<1x1x128xf32> to vector<2x8x128xf32>
    %139 = arith.mulf %2, %138 : vector<2x8x128xf32>
    %cst_31 = arith.constant dense<0.000000e+00> : vector<2x8xf32>
    %140 = vector.multi_reduction <add>, %139, %cst_31 [2] : vector<2x8x128xf32> to vector<2x8xf32>
    %141 = vector.shape_cast %140 : vector<2x8xf32> to vector<2x8x1xf32>
    %142 = vector.extract_strided_slice %129 {offsets = [1, 0], sizes = [1, 128], strides = [1, 1]} : vector<3x128xf32> to vector<1x128xf32>
    %143 = vector.shape_cast %142 : vector<1x128xf32> to vector<1x1x128xf32>
    %144 = vector.broadcast %143 : vector<1x1x128xf32> to vector<2x8x128xf32>
    %145 = arith.mulf %3, %144 : vector<2x8x128xf32>
    %cst_32 = arith.constant dense<0.000000e+00> : vector<2x8xf32>
    %146 = vector.multi_reduction <add>, %145, %cst_32 [2] : vector<2x8x128xf32> to vector<2x8xf32>
    %147 = vector.shape_cast %146 : vector<2x8xf32> to vector<2x8x1xf32>
    %148 = vector.broadcast %141 : vector<2x8x1xf32> to vector<2x8x8xf32>
    %149 = arith.addf %135, %148 : vector<2x8x8xf32>
    %150 = tpu.transpose %147, [0, 2, 1] : vector<2x8x1xf32> -> vector<2x1x8xf32>
    %151 = vector.broadcast %150 : vector<2x1x8xf32> to vector<2x8x8xf32>
    %152 = arith.addf %149, %151 : vector<2x8x8xf32>
    %cst_33 = arith.constant -1.000000e+09 : f32
    %153 = vector.broadcast %cst_33 : f32 to vector<2x8x8xf32>
    %154 = arith.select %128, %152, %153 : vector<2x8x8xi1>, vector<2x8x8xf32>
    %cst_34 = arith.constant dense<0xFF800000> : vector<2x16xf32>
    %155 = vector.multi_reduction <maximumf>, %96, %cst_34 [2] : vector<2x16x8xf32> to vector<2x16xf32>
    %156 = vector.shape_cast %155 : vector<2x16xf32> to vector<2x16x1xf32>
    %157 = vector.broadcast %156 : vector<2x16x1xf32> to vector<2x16x8xf32>
    %158 = arith.subf %96, %157 : vector<2x16x8xf32>
    %159 = math.exp %158 : vector<2x16x8xf32>
    %cst_35 = arith.constant dense<0.000000e+00> : vector<2x16xf32>
    %160 = vector.multi_reduction <add>, %159, %cst_35 [2] : vector<2x16x8xf32> to vector<2x16xf32>
    %161 = vector.shape_cast %160 : vector<2x16xf32> to vector<2x16x1xf32>
    %162 = tpu.reciprocal %161 {approx = true} : vector<2x16x1xf32> -> vector<2x16x1xf32>
    %163 = vector.broadcast %162 : vector<2x16x1xf32> to vector<2x16x8xf32>
    %164 = arith.mulf %159, %163 : vector<2x16x8xf32>
    %cst_36 = arith.constant dense<0xFF800000> : vector<2x1xf32>
    %165 = vector.multi_reduction <maximumf>, %156, %cst_36 [1] : vector<2x16x1xf32> to vector<2x1xf32>
    %166 = vector.shape_cast %165 : vector<2x1xf32> to vector<2x1x1xf32>
    %167 = vector.broadcast %166 : vector<2x1x1xf32> to vector<2x16x1xf32>
    %168 = arith.subf %156, %167 : vector<2x16x1xf32>
    %169 = math.exp %168 : vector<2x16x1xf32>
    %170 = vector.broadcast %169 : vector<2x16x1xf32> to vector<2x16x8xf32>
    %171 = arith.mulf %159, %170 : vector<2x16x8xf32>
    %cst_37 = arith.constant dense<0.000000e+00> : vector<2x8xf32>
    %172 = vector.multi_reduction <add>, %171, %cst_37 [1] : vector<2x16x8xf32> to vector<2x8xf32>
    %173 = vector.shape_cast %172 : vector<2x8xf32> to vector<2x1x8xf32>
    %cst_38 = arith.constant 0.000000e+00 : f32
    %174 = vector.broadcast %cst_38 : f32 to vector<2x1x8xf32>
    %175 = arith.cmpf ogt, %173, %174 : vector<2x1x8xf32>
    %176 = tpu.reciprocal %173 {approx = true} : vector<2x1x8xf32> -> vector<2x1x8xf32>
    %177 = vector.broadcast %176 : vector<2x1x8xf32> to vector<2x16x8xf32>
    %178 = arith.mulf %171, %177 : vector<2x16x8xf32>
    %cst_39 = arith.constant 6.250000e-02 : f32
    %179 = vector.shape_cast %175 : vector<2x1x8xi1> to vector<2x1x8xi1>
    %180 = vector.broadcast %179 : vector<2x1x8xi1> to vector<2x16x8xi1>
    %181 = vector.broadcast %cst_39 : f32 to vector<2x16x8xf32>
    %182 = arith.select %180, %178, %181 : vector<2x16x8xi1>, vector<2x16x8xf32>
    %cst_40 = arith.constant dense<0xFF800000> : vector<2x16xf32>
    %183 = vector.multi_reduction <maximumf>, %125, %cst_40 [2] : vector<2x16x8xf32> to vector<2x16xf32>
    %184 = vector.shape_cast %183 : vector<2x16xf32> to vector<2x16x1xf32>
    %185 = vector.broadcast %184 : vector<2x16x1xf32> to vector<2x16x8xf32>
    %186 = arith.subf %125, %185 : vector<2x16x8xf32>
    %187 = math.exp %186 : vector<2x16x8xf32>
    %cst_41 = arith.constant dense<0.000000e+00> : vector<2x16xf32>
    %188 = vector.multi_reduction <add>, %187, %cst_41 [2] : vector<2x16x8xf32> to vector<2x16xf32>
    %189 = vector.shape_cast %188 : vector<2x16xf32> to vector<2x16x1xf32>
    %190 = tpu.reciprocal %189 {approx = true} : vector<2x16x1xf32> -> vector<2x16x1xf32>
    %191 = vector.broadcast %190 : vector<2x16x1xf32> to vector<2x16x8xf32>
    %192 = arith.mulf %187, %191 : vector<2x16x8xf32>
    %cst_42 = arith.constant dense<0xFF800000> : vector<2x1xf32>
    %193 = vector.multi_reduction <maximumf>, %184, %cst_42 [1] : vector<2x16x1xf32> to vector<2x1xf32>
    %194 = vector.shape_cast %193 : vector<2x1xf32> to vector<2x1x1xf32>
    %195 = vector.broadcast %194 : vector<2x1x1xf32> to vector<2x16x1xf32>
    %196 = arith.subf %184, %195 : vector<2x16x1xf32>
    %197 = math.exp %196 : vector<2x16x1xf32>
    %198 = vector.broadcast %197 : vector<2x16x1xf32> to vector<2x16x8xf32>
    %199 = arith.mulf %187, %198 : vector<2x16x8xf32>
    %cst_43 = arith.constant dense<0.000000e+00> : vector<2x8xf32>
    %200 = vector.multi_reduction <add>, %199, %cst_43 [1] : vector<2x16x8xf32> to vector<2x8xf32>
    %201 = vector.shape_cast %200 : vector<2x8xf32> to vector<2x1x8xf32>
    %cst_44 = arith.constant 0.000000e+00 : f32
    %202 = vector.broadcast %cst_44 : f32 to vector<2x1x8xf32>
    %203 = arith.cmpf ogt, %201, %202 : vector<2x1x8xf32>
    %204 = tpu.reciprocal %201 {approx = true} : vector<2x1x8xf32> -> vector<2x1x8xf32>
    %205 = vector.broadcast %204 : vector<2x1x8xf32> to vector<2x16x8xf32>
    %206 = arith.mulf %199, %205 : vector<2x16x8xf32>
    %cst_45 = arith.constant 6.250000e-02 : f32
    %207 = vector.shape_cast %203 : vector<2x1x8xi1> to vector<2x1x8xi1>
    %208 = vector.broadcast %207 : vector<2x1x8xi1> to vector<2x16x8xi1>
    %209 = vector.broadcast %cst_45 : f32 to vector<2x16x8xf32>
    %210 = arith.select %208, %206, %209 : vector<2x16x8xi1>, vector<2x16x8xf32>
    %cst_46 = arith.constant dense<0xFF800000> : vector<2x8xf32>
    %211 = vector.multi_reduction <maximumf>, %154, %cst_46 [2] : vector<2x8x8xf32> to vector<2x8xf32>
    %212 = vector.shape_cast %211 : vector<2x8xf32> to vector<2x8x1xf32>
    %213 = vector.broadcast %212 : vector<2x8x1xf32> to vector<2x8x8xf32>
    %214 = arith.subf %154, %213 : vector<2x8x8xf32>
    %215 = math.exp %214 : vector<2x8x8xf32>
    %cst_47 = arith.constant dense<0.000000e+00> : vector<2x8xf32>
    %216 = vector.multi_reduction <add>, %215, %cst_47 [2] : vector<2x8x8xf32> to vector<2x8xf32>
    %217 = vector.shape_cast %216 : vector<2x8xf32> to vector<2x8x1xf32>
    %218 = tpu.reciprocal %217 {approx = true} : vector<2x8x1xf32> -> vector<2x8x1xf32>
    %219 = vector.broadcast %218 : vector<2x8x1xf32> to vector<2x8x8xf32>
    %220 = arith.mulf %215, %219 : vector<2x8x8xf32>
    %cst_48 = arith.constant dense<0xFF800000> : vector<2x1xf32>
    %221 = vector.multi_reduction <maximumf>, %212, %cst_48 [1] : vector<2x8x1xf32> to vector<2x1xf32>
    %222 = vector.shape_cast %221 : vector<2x1xf32> to vector<2x1x1xf32>
    %223 = vector.broadcast %222 : vector<2x1x1xf32> to vector<2x8x1xf32>
    %224 = arith.subf %212, %223 : vector<2x8x1xf32>
    %225 = math.exp %224 : vector<2x8x1xf32>
    %226 = vector.broadcast %225 : vector<2x8x1xf32> to vector<2x8x8xf32>
    %227 = arith.mulf %215, %226 : vector<2x8x8xf32>
    %cst_49 = arith.constant dense<0.000000e+00> : vector<2x8xf32>
    %228 = vector.multi_reduction <add>, %227, %cst_49 [1] : vector<2x8x8xf32> to vector<2x8xf32>
    %229 = vector.shape_cast %228 : vector<2x8xf32> to vector<2x1x8xf32>
    %cst_50 = arith.constant 0.000000e+00 : f32
    %230 = vector.broadcast %cst_50 : f32 to vector<2x1x8xf32>
    %231 = arith.cmpf ogt, %229, %230 : vector<2x1x8xf32>
    %232 = tpu.reciprocal %229 {approx = true} : vector<2x1x8xf32> -> vector<2x1x8xf32>
    %233 = vector.broadcast %232 : vector<2x1x8xf32> to vector<2x8x8xf32>
    %234 = arith.mulf %227, %233 : vector<2x8x8xf32>
    %cst_51 = arith.constant 1.250000e-01 : f32
    %235 = vector.shape_cast %231 : vector<2x1x8xi1> to vector<2x1x8xi1>
    %236 = vector.broadcast %235 : vector<2x1x8xi1> to vector<2x8x8xi1>
    %237 = vector.broadcast %cst_51 : f32 to vector<2x8x8xf32>
    %238 = arith.select %236, %234, %237 : vector<2x8x8xi1>, vector<2x8x8xf32>
    %239 = arith.truncf %164 : vector<2x16x8xf32> to vector<2x16x8xbf16>
    %240 = arith.truncf %182 : vector<2x16x8xf32> to vector<2x16x8xbf16>
    %241 = arith.truncf %192 : vector<2x16x8xf32> to vector<2x16x8xbf16>
    %242 = arith.truncf %210 : vector<2x16x8xf32> to vector<2x16x8xbf16>
    %243 = arith.truncf %220 : vector<2x8x8xf32> to vector<2x8x8xbf16>
    %244 = arith.truncf %238 : vector<2x8x8xf32> to vector<2x8x8xbf16>
    "tpu.trace_start"() <{level = 10 : i32, message = "bmk,bkd->bmd"}> : () -> ()
    %cst_52 = arith.constant dense<0.000000e+00> : vector<2x16x128xf32>
    %245 = tpu.matmul %239, %5, %cst_52 {dimension_numbers = #tpu.dot_dimension_numbers<[2], [1], [1], [2], [0, 0, 0, 1, 1, 2], [0], [0]>} : vector<2x16x8xbf16>, vector<2x8x128xbf16>, vector<2x16x128xf32> -> vector<2x16x128xf32>
    "tpu.trace_stop"() : () -> ()
    "tpu.trace_start"() <{level = 10 : i32, message = "bmk,bmd->bkd"}> : () -> ()
    %cst_53 = arith.constant dense<0.000000e+00> : vector<2x8x128xf32>
    %246 = tpu.matmul %240, %4, %cst_53 {dimension_numbers = #tpu.dot_dimension_numbers<[1], [1], [2], [2], [0, 0, 0, 2, 1, 2], [0], [0]>} : vector<2x16x8xbf16>, vector<2x16x128xbf16>, vector<2x8x128xf32> -> vector<2x8x128xf32>
    "tpu.trace_stop"() : () -> ()
    "tpu.trace_start"() <{level = 10 : i32, message = "bmk,bkd->bmd"}> : () -> ()
    %cst_54 = arith.constant dense<0.000000e+00> : vector<2x16x128xf32>
    %247 = tpu.matmul %241, %6, %cst_54 {dimension_numbers = #tpu.dot_dimension_numbers<[2], [1], [1], [2], [0, 0, 0, 1, 1, 2], [0], [0]>} : vector<2x16x8xbf16>, vector<2x8x128xbf16>, vector<2x16x128xf32> -> vector<2x16x128xf32>
    "tpu.trace_stop"() : () -> ()
    "tpu.trace_start"() <{level = 10 : i32, message = "bmk,bmd->bkd"}> : () -> ()
    %cst_55 = arith.constant dense<0.000000e+00> : vector<2x8x128xf32>
    %248 = tpu.matmul %242, %4, %cst_55 {dimension_numbers = #tpu.dot_dimension_numbers<[1], [1], [2], [2], [0, 0, 0, 2, 1, 2], [0], [0]>} : vector<2x16x8xbf16>, vector<2x16x128xbf16>, vector<2x8x128xf32> -> vector<2x8x128xf32>
    "tpu.trace_stop"() : () -> ()
    "tpu.trace_start"() <{level = 10 : i32, message = "bmk,bkd->bmd"}> : () -> ()
    %cst_56 = arith.constant dense<0.000000e+00> : vector<2x8x128xf32>
    %249 = tpu.matmul %243, %6, %cst_56 {dimension_numbers = #tpu.dot_dimension_numbers<[2], [1], [1], [2], [0, 0, 0, 1, 1, 2], [0], [0]>} : vector<2x8x8xbf16>, vector<2x8x128xbf16>, vector<2x8x128xf32> -> vector<2x8x128xf32>
    "tpu.trace_stop"() : () -> ()
    "tpu.trace_start"() <{level = 10 : i32, message = "bmk,bmd->bkd"}> : () -> ()
    %cst_57 = arith.constant dense<0.000000e+00> : vector<2x8x128xf32>
    %250 = tpu.matmul %244, %5, %cst_57 {dimension_numbers = #tpu.dot_dimension_numbers<[1], [1], [2], [2], [0, 0, 0, 2, 1, 2], [0], [0]>} : vector<2x8x8xbf16>, vector<2x8x128xbf16>, vector<2x8x128xf32> -> vector<2x8x128xf32>
    "tpu.trace_stop"() : () -> ()
    %251 = arith.truncf %245 : vector<2x16x128xf32> to vector<2x16x128xbf16>
    %252 = arith.truncf %246 : vector<2x8x128xf32> to vector<2x8x128xbf16>
    %253 = arith.truncf %247 : vector<2x16x128xf32> to vector<2x16x128xbf16>
    %254 = arith.truncf %248 : vector<2x8x128xf32> to vector<2x8x128xbf16>
    %255 = arith.truncf %249 : vector<2x8x128xf32> to vector<2x8x128xbf16>
    %256 = arith.truncf %250 : vector<2x8x128xf32> to vector<2x8x128xbf16>
    %257 = arith.mulf %1, %245 : vector<2x16x128xf32>
    %258 = arith.mulf %1, %247 : vector<2x16x128xf32>
    "tpu.trace_start"() <{level = 10 : i32, message = "bmk,bkd->bmd"}> : () -> ()
    %cst_58 = arith.constant dense<0.000000e+00> : vector<2x16x128xf32>
    %259 = tpu.matmul %239, %252, %cst_58 {dimension_numbers = #tpu.dot_dimension_numbers<[2], [1], [1], [2], [0, 0, 0, 1, 1, 2], [0], [0]>} : vector<2x16x8xbf16>, vector<2x8x128xbf16>, vector<2x16x128xf32> -> vector<2x16x128xf32>
    %cst_59 = arith.constant dense<0.000000e+00> : vector<2x16x128xf32>
    %260 = tpu.matmul %239, %255, %cst_59 {dimension_numbers = #tpu.dot_dimension_numbers<[2], [1], [1], [2], [0, 0, 0, 1, 1, 2], [0], [0]>} : vector<2x16x8xbf16>, vector<2x8x128xbf16>, vector<2x16x128xf32> -> vector<2x16x128xf32>
    %cst_60 = arith.constant dense<0.000000e+00> : vector<2x16x128xf32>
    %261 = tpu.matmul %241, %254, %cst_60 {dimension_numbers = #tpu.dot_dimension_numbers<[2], [1], [1], [2], [0, 0, 0, 1, 1, 2], [0], [0]>} : vector<2x16x8xbf16>, vector<2x8x128xbf16>, vector<2x16x128xf32> -> vector<2x16x128xf32>
    %cst_61 = arith.constant dense<0.000000e+00> : vector<2x16x128xf32>
    %262 = tpu.matmul %241, %256, %cst_61 {dimension_numbers = #tpu.dot_dimension_numbers<[2], [1], [1], [2], [0, 0, 0, 1, 1, 2], [0], [0]>} : vector<2x16x8xbf16>, vector<2x8x128xbf16>, vector<2x16x128xf32> -> vector<2x16x128xf32>
    "tpu.trace_stop"() : () -> ()
    %c0_62 = arith.constant 0 : index
    %c0_63 = arith.constant 0 : index
    %c0_64 = arith.constant 0 : index
    %263 = vector.load %arg8[%c0_62, %c0_63, %c0_64] : memref<2x16x1152xf32, #tpu.memory_space<vmem>>, vector<2x16x128xf32>
    tpu.vector_store %arg8[%c0_62, %c0_63, %c0_64], %1 {strides = array<i32>} : memref<2x16x1152xf32, #tpu.memory_space<vmem>>, vector<2x16x128xf32>,
    %c0_65 = arith.constant 0 : index
    %c0_66 = arith.constant 0 : index
    %c128 = arith.constant 128 : index
    %264 = vector.load %arg8[%c0_65, %c0_66, %c128] : memref<2x16x1152xf32, #tpu.memory_space<vmem>>, vector<2x16x128xf32>
    tpu.vector_store %arg8[%c0_65, %c0_66, %c128], %245 {strides = array<i32>} : memref<2x16x1152xf32, #tpu.memory_space<vmem>>, vector<2x16x128xf32>,
    %c0_67 = arith.constant 0 : index
    %c0_68 = arith.constant 0 : index
    %c256 = arith.constant 256 : index
    %265 = vector.load %arg8[%c0_67, %c0_68, %c256] : memref<2x16x1152xf32, #tpu.memory_space<vmem>>, vector<2x16x128xf32>
    tpu.vector_store %arg8[%c0_67, %c0_68, %c256], %247 {strides = array<i32>} : memref<2x16x1152xf32, #tpu.memory_space<vmem>>, vector<2x16x128xf32>,
    %c0_69 = arith.constant 0 : index
    %c0_70 = arith.constant 0 : index
    %c384 = arith.constant 384 : index
    %266 = vector.load %arg8[%c0_69, %c0_70, %c384] : memref<2x16x1152xf32, #tpu.memory_space<vmem>>, vector<2x16x128xf32>
    tpu.vector_store %arg8[%c0_69, %c0_70, %c384], %257 {strides = array<i32>} : memref<2x16x1152xf32, #tpu.memory_space<vmem>>, vector<2x16x128xf32>,
    %c0_71 = arith.constant 0 : index
    %c0_72 = arith.constant 0 : index
    %c512 = arith.constant 512 : index
    %267 = vector.load %arg8[%c0_71, %c0_72, %c512] : memref<2x16x1152xf32, #tpu.memory_space<vmem>>, vector<2x16x128xf32>
    tpu.vector_store %arg8[%c0_71, %c0_72, %c512], %258 {strides = array<i32>} : memref<2x16x1152xf32, #tpu.memory_space<vmem>>, vector<2x16x128xf32>,
    %c0_73 = arith.constant 0 : index
    %c0_74 = arith.constant 0 : index
    %c640 = arith.constant 640 : index
    %268 = vector.load %arg8[%c0_73, %c0_74, %c640] : memref<2x16x1152xf32, #tpu.memory_space<vmem>>, vector<2x16x128xf32>
    tpu.vector_store %arg8[%c0_73, %c0_74, %c640], %259 {strides = array<i32>} : memref<2x16x1152xf32, #tpu.memory_space<vmem>>, vector<2x16x128xf32>,
    %c0_75 = arith.constant 0 : index
    %c0_76 = arith.constant 0 : index
    %c768 = arith.constant 768 : index
    %269 = vector.load %arg8[%c0_75, %c0_76, %c768] : memref<2x16x1152xf32, #tpu.memory_space<vmem>>, vector<2x16x128xf32>
    tpu.vector_store %arg8[%c0_75, %c0_76, %c768], %260 {strides = array<i32>} : memref<2x16x1152xf32, #tpu.memory_space<vmem>>, vector<2x16x128xf32>,
    %c0_77 = arith.constant 0 : index
    %c0_78 = arith.constant 0 : index
    %c896 = arith.constant 896 : index
    %270 = vector.load %arg8[%c0_77, %c0_78, %c896] : memref<2x16x1152xf32, #tpu.memory_space<vmem>>, vector<2x16x128xf32>
    tpu.vector_store %arg8[%c0_77, %c0_78, %c896], %261 {strides = array<i32>} : memref<2x16x1152xf32, #tpu.memory_space<vmem>>, vector<2x16x128xf32>,
    %c0_79 = arith.constant 0 : index
    %c0_80 = arith.constant 0 : index
    %c1024 = arith.constant 1024 : index
    %271 = vector.load %arg8[%c0_79, %c0_80, %c1024] : memref<2x16x1152xf32, #tpu.memory_space<vmem>>, vector<2x16x128xf32>
    tpu.vector_store %arg8[%c0_79, %c0_80, %c1024], %262 {strides = array<i32>} : memref<2x16x1152xf32, #tpu.memory_space<vmem>>, vector<2x16x128xf32>,
    %272 = arith.mulf %2, %246 : vector<2x8x128xf32>
    %273 = arith.mulf %2, %249 : vector<2x8x128xf32>
    "tpu.trace_start"() <{level = 10 : i32, message = "bmk,bmd->bkd"}> : () -> ()
    %cst_81 = arith.constant dense<0.000000e+00> : vector<2x8x128xf32>
    %274 = tpu.matmul %240, %251, %cst_81 {dimension_numbers = #tpu.dot_dimension_numbers<[1], [1], [2], [2], [0, 0, 0, 2, 1, 2], [0], [0]>} : vector<2x16x8xbf16>, vector<2x16x128xbf16>, vector<2x8x128xf32> -> vector<2x8x128xf32>
    %cst_82 = arith.constant dense<0.000000e+00> : vector<2x8x128xf32>
    %275 = tpu.matmul %240, %253, %cst_82 {dimension_numbers = #tpu.dot_dimension_numbers<[1], [1], [2], [2], [0, 0, 0, 2, 1, 2], [0], [0]>} : vector<2x16x8xbf16>, vector<2x16x128xbf16>, vector<2x8x128xf32> -> vector<2x8x128xf32>
    "tpu.trace_stop"() : () -> ()
    "tpu.trace_start"() <{level = 10 : i32, message = "bmk,bkd->bmd"}> : () -> ()
    %cst_83 = arith.constant dense<0.000000e+00> : vector<2x8x128xf32>
    %276 = tpu.matmul %243, %254, %cst_83 {dimension_numbers = #tpu.dot_dimension_numbers<[2], [1], [1], [2], [0, 0, 0, 1, 1, 2], [0], [0]>} : vector<2x8x8xbf16>, vector<2x8x128xbf16>, vector<2x8x128xf32> -> vector<2x8x128xf32>
    %cst_84 = arith.constant dense<0.000000e+00> : vector<2x8x128xf32>
    %277 = tpu.matmul %243, %256, %cst_84 {dimension_numbers = #tpu.dot_dimension_numbers<[2], [1], [1], [2], [0, 0, 0, 1, 1, 2], [0], [0]>} : vector<2x8x8xbf16>, vector<2x8x128xbf16>, vector<2x8x128xf32> -> vector<2x8x128xf32>
    "tpu.trace_stop"() : () -> ()
    %c0_85 = arith.constant 0 : index
    %c0_86 = arith.constant 0 : index
    %c0_87 = arith.constant 0 : index
    %278 = vector.load %arg9[%c0_85, %c0_86, %c0_87] : memref<2x8x1152xf32, #tpu.memory_space<vmem>>, vector<2x8x128xf32>
    tpu.vector_store %arg9[%c0_85, %c0_86, %c0_87], %2 {strides = array<i32>} : memref<2x8x1152xf32, #tpu.memory_space<vmem>>, vector<2x8x128xf32>,
    %c0_88 = arith.constant 0 : index
    %c0_89 = arith.constant 0 : index
    %c128_90 = arith.constant 128 : index
    %279 = vector.load %arg9[%c0_88, %c0_89, %c128_90] : memref<2x8x1152xf32, #tpu.memory_space<vmem>>, vector<2x8x128xf32>
    tpu.vector_store %arg9[%c0_88, %c0_89, %c128_90], %246 {strides = array<i32>} : memref<2x8x1152xf32, #tpu.memory_space<vmem>>, vector<2x8x128xf32>,
    %c0_91 = arith.constant 0 : index
    %c0_92 = arith.constant 0 : index
    %c256_93 = arith.constant 256 : index
    %280 = vector.load %arg9[%c0_91, %c0_92, %c256_93] : memref<2x8x1152xf32, #tpu.memory_space<vmem>>, vector<2x8x128xf32>
    tpu.vector_store %arg9[%c0_91, %c0_92, %c256_93], %249 {strides = array<i32>} : memref<2x8x1152xf32, #tpu.memory_space<vmem>>, vector<2x8x128xf32>,
    %c0_94 = arith.constant 0 : index
    %c0_95 = arith.constant 0 : index
    %c384_96 = arith.constant 384 : index
    %281 = vector.load %arg9[%c0_94, %c0_95, %c384_96] : memref<2x8x1152xf32, #tpu.memory_space<vmem>>, vector<2x8x128xf32>
    tpu.vector_store %arg9[%c0_94, %c0_95, %c384_96], %272 {strides = array<i32>} : memref<2x8x1152xf32, #tpu.memory_space<vmem>>, vector<2x8x128xf32>,
    %c0_97 = arith.constant 0 : index
    %c0_98 = arith.constant 0 : index
    %c512_99 = arith.constant 512 : index
    %282 = vector.load %arg9[%c0_97, %c0_98, %c512_99] : memref<2x8x1152xf32, #tpu.memory_space<vmem>>, vector<2x8x128xf32>
    tpu.vector_store %arg9[%c0_97, %c0_98, %c512_99], %273 {strides = array<i32>} : memref<2x8x1152xf32, #tpu.memory_space<vmem>>, vector<2x8x128xf32>,
    %c0_100 = arith.constant 0 : index
    %c0_101 = arith.constant 0 : index
    %c640_102 = arith.constant 640 : index
    %283 = vector.load %arg9[%c0_100, %c0_101, %c640_102] : memref<2x8x1152xf32, #tpu.memory_space<vmem>>, vector<2x8x128xf32>
    tpu.vector_store %arg9[%c0_100, %c0_101, %c640_102], %274 {strides = array<i32>} : memref<2x8x1152xf32, #tpu.memory_space<vmem>>, vector<2x8x128xf32>,
    %c0_103 = arith.constant 0 : index
    %c0_104 = arith.constant 0 : index
    %c768_105 = arith.constant 768 : index
    %284 = vector.load %arg9[%c0_103, %c0_104, %c768_105] : memref<2x8x1152xf32, #tpu.memory_space<vmem>>, vector<2x8x128xf32>
    tpu.vector_store %arg9[%c0_103, %c0_104, %c768_105], %275 {strides = array<i32>} : memref<2x8x1152xf32, #tpu.memory_space<vmem>>, vector<2x8x128xf32>,
    %c0_106 = arith.constant 0 : index
    %c0_107 = arith.constant 0 : index
    %c896_108 = arith.constant 896 : index
    %285 = vector.load %arg9[%c0_106, %c0_107, %c896_108] : memref<2x8x1152xf32, #tpu.memory_space<vmem>>, vector<2x8x128xf32>
    tpu.vector_store %arg9[%c0_106, %c0_107, %c896_108], %276 {strides = array<i32>} : memref<2x8x1152xf32, #tpu.memory_space<vmem>>, vector<2x8x128xf32>,
    %c0_109 = arith.constant 0 : index
    %c0_110 = arith.constant 0 : index
    %c1024_111 = arith.constant 1024 : index
    %286 = vector.load %arg9[%c0_109, %c0_110, %c1024_111] : memref<2x8x1152xf32, #tpu.memory_space<vmem>>, vector<2x8x128xf32>
    tpu.vector_store %arg9[%c0_109, %c0_110, %c1024_111], %277 {strides = array<i32>} : memref<2x8x1152xf32, #tpu.memory_space<vmem>>, vector<2x8x128xf32>,
    %287 = arith.mulf %3, %248 : vector<2x8x128xf32>
    %288 = arith.mulf %3, %250 : vector<2x8x128xf32>
    "tpu.trace_start"() <{level = 10 : i32, message = "bmk,bmd->bkd"}> : () -> ()
    %cst_112 = arith.constant dense<0.000000e+00> : vector<2x8x128xf32>
    %289 = tpu.matmul %242, %251, %cst_112 {dimension_numbers = #tpu.dot_dimension_numbers<[1], [1], [2], [2], [0, 0, 0, 2, 1, 2], [0], [0]>} : vector<2x16x8xbf16>, vector<2x16x128xbf16>, vector<2x8x128xf32> -> vector<2x8x128xf32>
    %cst_113 = arith.constant dense<0.000000e+00> : vector<2x8x128xf32>
    %290 = tpu.matmul %242, %253, %cst_113 {dimension_numbers = #tpu.dot_dimension_numbers<[1], [1], [2], [2], [0, 0, 0, 2, 1, 2], [0], [0]>} : vector<2x16x8xbf16>, vector<2x16x128xbf16>, vector<2x8x128xf32> -> vector<2x8x128xf32>
    %cst_114 = arith.constant dense<0.000000e+00> : vector<2x8x128xf32>
    %291 = tpu.matmul %244, %252, %cst_114 {dimension_numbers = #tpu.dot_dimension_numbers<[1], [1], [2], [2], [0, 0, 0, 2, 1, 2], [0], [0]>} : vector<2x8x8xbf16>, vector<2x8x128xbf16>, vector<2x8x128xf32> -> vector<2x8x128xf32>
    %cst_115 = arith.constant dense<0.000000e+00> : vector<2x8x128xf32>
    %292 = tpu.matmul %244, %255, %cst_115 {dimension_numbers = #tpu.dot_dimension_numbers<[1], [1], [2], [2], [0, 0, 0, 2, 1, 2], [0], [0]>} : vector<2x8x8xbf16>, vector<2x8x128xbf16>, vector<2x8x128xf32> -> vector<2x8x128xf32>
    "tpu.trace_stop"() : () -> ()
    %c0_116 = arith.constant 0 : index
    %c0_117 = arith.constant 0 : index
    %c0_118 = arith.constant 0 : index
    %293 = vector.load %arg10[%c0_116, %c0_117, %c0_118] : memref<2x8x1152xf32, #tpu.memory_space<vmem>>, vector<2x8x128xf32>
    tpu.vector_store %arg10[%c0_116, %c0_117, %c0_118], %3 {strides = array<i32>} : memref<2x8x1152xf32, #tpu.memory_space<vmem>>, vector<2x8x128xf32>,
    %c0_119 = arith.constant 0 : index
    %c0_120 = arith.constant 0 : index
    %c128_121 = arith.constant 128 : index
    %294 = vector.load %arg10[%c0_119, %c0_120, %c128_121] : memref<2x8x1152xf32, #tpu.memory_space<vmem>>, vector<2x8x128xf32>
    tpu.vector_store %arg10[%c0_119, %c0_120, %c128_121], %248 {strides = array<i32>} : memref<2x8x1152xf32, #tpu.memory_space<vmem>>, vector<2x8x128xf32>,
    %c0_122 = arith.constant 0 : index
    %c0_123 = arith.constant 0 : index
    %c256_124 = arith.constant 256 : index
    %295 = vector.load %arg10[%c0_122, %c0_123, %c256_124] : memref<2x8x1152xf32, #tpu.memory_space<vmem>>, vector<2x8x128xf32>
    tpu.vector_store %arg10[%c0_122, %c0_123, %c256_124], %250 {strides = array<i32>} : memref<2x8x1152xf32, #tpu.memory_space<vmem>>, vector<2x8x128xf32>,
    %c0_125 = arith.constant 0 : index
    %c0_126 = arith.constant 0 : index
    %c384_127 = arith.constant 384 : index
    %296 = vector.load %arg10[%c0_125, %c0_126, %c384_127] : memref<2x8x1152xf32, #tpu.memory_space<vmem>>, vector<2x8x128xf32>
    tpu.vector_store %arg10[%c0_125, %c0_126, %c384_127], %287 {strides = array<i32>} : memref<2x8x1152xf32, #tpu.memory_space<vmem>>, vector<2x8x128xf32>,
    %c0_128 = arith.constant 0 : index
    %c0_129 = arith.constant 0 : index
    %c512_130 = arith.constant 512 : index
    %297 = vector.load %arg10[%c0_128, %c0_129, %c512_130] : memref<2x8x1152xf32, #tpu.memory_space<vmem>>, vector<2x8x128xf32>
    tpu.vector_store %arg10[%c0_128, %c0_129, %c512_130], %288 {strides = array<i32>} : memref<2x8x1152xf32, #tpu.memory_space<vmem>>, vector<2x8x128xf32>,
    %c0_131 = arith.constant 0 : index
    %c0_132 = arith.constant 0 : index
    %c640_133 = arith.constant 640 : index
    %298 = vector.load %arg10[%c0_131, %c0_132, %c640_133] : memref<2x8x1152xf32, #tpu.memory_space<vmem>>, vector<2x8x128xf32>
    tpu.vector_store %arg10[%c0_131, %c0_132, %c640_133], %289 {strides = array<i32>} : memref<2x8x1152xf32, #tpu.memory_space<vmem>>, vector<2x8x128xf32>,
    %c0_134 = arith.constant 0 : index
    %c0_135 = arith.constant 0 : index
    %c768_136 = arith.constant 768 : index
    %299 = vector.load %arg10[%c0_134, %c0_135, %c768_136] : memref<2x8x1152xf32, #tpu.memory_space<vmem>>, vector<2x8x128xf32>
    tpu.vector_store %arg10[%c0_134, %c0_135, %c768_136], %290 {strides = array<i32>} : memref<2x8x1152xf32, #tpu.memory_space<vmem>>, vector<2x8x128xf32>,
    %c0_137 = arith.constant 0 : index
    %c0_138 = arith.constant 0 : index
    %c896_139 = arith.constant 896 : index
    %300 = vector.load %arg10[%c0_137, %c0_138, %c896_139] : memref<2x8x1152xf32, #tpu.memory_space<vmem>>, vector<2x8x128xf32>
    tpu.vector_store %arg10[%c0_137, %c0_138, %c896_139], %291 {strides = array<i32>} : memref<2x8x1152xf32, #tpu.memory_space<vmem>>, vector<2x8x128xf32>,
    %c0_140 = arith.constant 0 : index
    %c0_141 = arith.constant 0 : index
    %c1024_142 = arith.constant 1024 : index
    %301 = vector.load %arg10[%c0_140, %c0_141, %c1024_142] : memref<2x8x1152xf32, #tpu.memory_space<vmem>>, vector<2x8x128xf32>
    tpu.vector_store %arg10[%c0_140, %c0_141, %c1024_142], %292 {strides = array<i32>} : memref<2x8x1152xf32, #tpu.memory_space<vmem>>, vector<2x8x128xf32>,
    return
  }
  func.func @transform_0(%arg0: i32, %arg1: memref<8xi32, #tpu.memory_space<smem>>, %arg2: memref<8xi32, #tpu.memory_space<smem>>, %arg3: memref<8xi32, #tpu.memory_space<smem>>) -> (i32, i32, i32) {
    %c0_i32 = arith.constant 0 : i32
    %c0_i32_0 = arith.constant 0 : i32
    %c0_i32_1 = arith.constant 0 : i32
    return %arg0, %c0_i32, %c0_i32_0 : i32, i32, i32
  }
  func.func @transform_1(%arg0: i32, %arg1: memref<8xi32, #tpu.memory_space<smem>>, %arg2: memref<8xi32, #tpu.memory_space<smem>>, %arg3: memref<8xi32, #tpu.memory_space<smem>>) -> (i32, i32, i32) {
    %c0_i32 = arith.constant 0 : i32
    %c0_i32_0 = arith.constant 0 : i32
    %c0_i32_1 = arith.constant 0 : i32
    return %arg0, %c0_i32, %c0_i32_0 : i32, i32, i32
  }
  func.func @transform_2(%arg0: i32, %arg1: memref<8xi32, #tpu.memory_space<smem>>, %arg2: memref<8xi32, #tpu.memory_space<smem>>, %arg3: memref<8xi32, #tpu.memory_space<smem>>) -> (i32, i32, i32) {
    %c0_i32 = arith.constant 0 : i32
    %c0_i32_0 = arith.constant 0 : i32
    %c0_i32_1 = arith.constant 0 : i32
    return %arg0, %c0_i32, %c0_i32_0 : i32, i32, i32
  }
  func.func @transform_3(%arg0: i32, %arg1: memref<8xi32, #tpu.memory_space<smem>>, %arg2: memref<8xi32, #tpu.memory_space<smem>>, %arg3: memref<8xi32, #tpu.memory_space<smem>>) -> (i32, i32) {
    %c0_i32 = arith.constant 0 : i32
    %c0_i32_0 = arith.constant 0 : i32
    %c0_i32_1 = arith.constant 0 : i32
    return %c0_i32, %c0_i32_0 : i32, i32
  }
  func.func @transform_4(%arg0: i32, %arg1: memref<8xi32, #tpu.memory_space<smem>>, %arg2: memref<8xi32, #tpu.memory_space<smem>>, %arg3: memref<8xi32, #tpu.memory_space<smem>>) -> (i32, i32, i32) {
    %c0_i32 = arith.constant 0 : i32
    %c0_i32_0 = arith.constant 0 : i32
    %c0_i32_1 = arith.constant 0 : i32
    return %arg0, %c0_i32, %c0_i32_0 : i32, i32, i32
  }
  func.func @transform_5(%arg0: i32, %arg1: memref<8xi32, #tpu.memory_space<smem>>, %arg2: memref<8xi32, #tpu.memory_space<smem>>, %arg3: memref<8xi32, #tpu.memory_space<smem>>) -> (i32, i32, i32) {
    %c0_i32 = arith.constant 0 : i32
    %c0_i32_0 = arith.constant 0 : i32
    %c0_i32_1 = arith.constant 0 : i32
    return %arg0, %c0_i32, %c0_i32_0 : i32, i32, i32
  }
  func.func @transform_6(%arg0: i32, %arg1: memref<8xi32, #tpu.memory_space<smem>>, %arg2: memref<8xi32, #tpu.memory_space<smem>>, %arg3: memref<8xi32, #tpu.memory_space<smem>>) -> (i32, i32, i32) {
    %c0_i32 = arith.constant 0 : i32
    %c0_i32_0 = arith.constant 0 : i32
    %c0_i32_1 = arith.constant 0 : i32
    return %arg0, %c0_i32, %c0_i32_0 : i32, i32, i32
  }
}

</mosaic_0001>

<bundles_post_ra>
// kernel: tpu_custom_call.1
= control target key start
LH: loop header
LB: loop body
LE: loop exit
PB: predicated region body
PF: predicated region fallthrough
CT: control target
= control target key end

     0   :  { %s4177_s30 = smov [#allocation3]   ;;  %s5437_s0 = inlined_call_operand.hbm [shape: s32[8], index: 0, kind: input, shape index: {}]   ;;  %s5438_s3 = inlined_call_operand.hbm [shape: f32[8,16,128], index: 3, kind: input, shape index: {}]   ;;  %s5439_s4 = inlined_call_operand.hbm [shape: f32[8,8,128], index: 4, kind: input, shape index: {}]   ;;  %s5440_s5 = inlined_call_operand.hbm [shape: f32[8,8,128], index: 5, kind: input, shape index: {}]   ;;  %s5441_s6 = inlined_call_operand.hbm [shape: f32[9,128], index: 6, kind: input, shape index: {}]   ;;  %s5442_s7 = inlined_call_operand.hbm [shape: f32[8,16,1152], index: 7, kind: output, shape index: {0}]   ;;  %s5443_s8 = inlined_call_operand.hbm [shape: f32[8,8,1152], index: 8, kind: output, shape index: {1}]   ;;  %s5444_s9 = inlined_call_operand.hbm [shape: f32[8,8,1152], index: 9, kind: output, shape index: {2}]   ;;  %s5445_s1 = inlined_call_operand.vmem [shape: s32[8], index: 1, kind: input, shape index: {}]   ;;  %s5446_s2 = inlined_call_operand.vmem [shape: s32[8], index: 2, kind: input, shape index: {}]  }
   0x1   :  { %5464 = sst [smem:[#allocation30_spill]] %s5439_s4  ;;  %s17_s14 = sshll.u32 %s5445_s1, 4  ;;  %s18_s14 = int_to_ptr.vmem [resolvable:$true] %s17_s14 }
   0x2   :  { %16 = dma.hbm_to_smem %s5437_s0, 16, %s4177_s30, [#allocation2] }
   0x3   :  { %s21_s17 = sshll.u32 %s5446_s2, 4  ;;  %s3911_s18 = scalar_lea.vmem %s18_s14, 16  ;;  %s22_s17 = int_to_ptr.vmem [resolvable:$true] %s21_s17 }
   0x4   :  { %p3912_p0 = scmp.ne.s32.totalorder %s18_s14, %s3911_s18  ;;  %p3916_p1 = scmp.lt.s32.totalorder %s18_s14, %s18_s14 }
   0x5   :  { %p3917_p2 = scmp.lt.s32.totalorder %s3911_s18, %s3911_s18 }
   0x7   :  { %p3918_p3 = por %p3917_p2, %p3916_p1 }
   0x9   :  { %p3919_p4 = pnand %p3918_p3, %p3912_p0 }
   0xb   :  { %3922 = shalt.err (!%p3919_p4)  }
   0xc   :  { %s4178_s19 = smov [#allocation4]   ;;  %s3923_s0 = scalar_lea.vmem %s22_s17, 16 }
   0xd   :  { %20 = dma.vmem_to_smem %s18_s14, 16, %s4178_s19, [#allocation2] }
   0xe   :  { %p3924_p5 = scmp.ne.s32.totalorder %s22_s17, %s3923_s0  ;;  %p3928_p6 = scmp.lt.s32.totalorder %s22_s17, %s22_s17 }
   0xf   :  { %p3929_p7 = scmp.lt.s32.totalorder %s3923_s0, %s3923_s0 }
  0x11   :  { %p3930_p8 = por %p3929_p7, %p3928_p6 }
  0x13   :  { %p3931_p9 = pnand %p3930_p8, %p3924_p5 }
  0x15   :  { %3934 = shalt.err (!%p3931_p9)  }
  0x16   :  { %s4179_s1 = smov [#allocation5]  }
  0x17   :  { %24 = dma.vmem_to_smem %s22_s17, 16, %s4179_s1, [#allocation2] }
  0x18   :  { %4139 = dma.done.wait [#allocation2], 48 }
  0x19   :  { %4140 = vsyncadd [#allocation2], 4294967248 }
  0x1a   :  { %26 = sfence }
  0x1b   :  { %27 = vsyncpa [#allocation7], 0 }
  0x1c   :  { %29 = vsyncpa [#allocation7 + $0x1], 0 }
  0x1d   :  { %30 = vsyncpa [#allocation10], 0 }
  0x1e   :  { %32 = vsyncpa [#allocation10 + $0x1], 0 }
  0x1f   :  { %33 = vsyncpa [#allocation13], 0 }
  0x20   :  { %34 = vsyncpa [#allocation8], 0 }
  0x21   :  { %36 = vsyncpa [#allocation8 + $0x1], 0 }
  0x22   :  { %37 = vsyncpa [#allocation16], 0 }
  0x23   :  { %39 = vsyncpa [#allocation16 + $0x1], 0  ;;  %s4252_s2 = smov 0   ;;  %s4254_s20 = smov 0  }
  0x24   :  { %s4256_s21 = smov 0   ;;  %s4258_s22 = smov 0  }
  0x25 LB: > { %5465 = sst [smem:[#allocation24_spill]] %s4163_s2  ;;  %s4273_s23 = sadd.s32 1, %s4175_s22   ;;  %s4175_s22 = sphi %s4258_s22, %s5510_s22   ;;  %s4171_s21 = sphi %s4256_s21, %s5512_s21   ;;  %s4167_s20 = sphi %s4254_s20, %s5514_s20   ;;  %s4163_s2 = sphi %s4252_s2, %s5513_s2  }
  0x26   : > { %5466 = sst [smem:[#allocation25_spill]] %s4171_s21  ;;  %s52_s24 = sadd.s32 1, %s4171_s21 }
  0x27   : > { %5467 = sst [smem:[#allocation26_spill]] %s4175_s22  ;;  %s49_s25 = ssub.s32 %s4175_s22, %s4273_s23 }
  0x28   : > { %5468 = sst [smem:[#allocation27_spill]] %s4273_s23  ;;  %p5447_p10 = scmp.ne.s32.totalorder %s4171_s21, %s4167_s20 }
  0x29   : > { %p50_p11 = scmp.eq.s32.totalorder %s49_s25, 0  ;;  %p60_p12 = scmp.eq.s32.totalorder %s4175_s22, 0 }
  0x2a   : > { %p3777_p0 = scmp.lt.s32.totalorder %s4175_s22, 4  ;;  %s4289_s27 = sand.u32 1, %s4171_s21  }
  0x2b   : > { %s4282_s26 = scalar_select %p50_p11, %s4171_s21, %s52_s24  }
  0x2c   : > { %p61_p13 = por %p60_p12, %p5447_p10  ;;  %s275_s28 = sand.u32 1, %s4175_s22  }
  0x2d   : > { %5469 = sst [smem:[#allocation28_spill]] %s4282_s26  ;;  %s3331_s29 = sshll.u32 %s4289_s27, 4 }
  0x2e   : > { %p4293_p1 = pnand %p3777_p0, %p61_p13  ;;  %s3393_s10 = sshll.u32 %s4175_s22, 8 }
  0x2f   : > { %s5471_s4 = sld [smem:[#allocation30_spill]]  ;;  %s279_s14 = scalar_lea.vmem [#allocation9], %s3331_s29 }
  0x30   : > { %s286_s15 = sshll.u32 %s279_s14, 4  ;;  %s4309_s16 = scalar_lea.sflag [#allocation10], %s275_s28  ;;  %s4307_s15 = int_to_ptr.vmem [resolvable:$true] %s286_s15 }
  0x31   : > { %p4315_p3 = pneg %p4293_p1 }
  0x35   : > { %s4303_s13 = scalar_lea.hbm %s5471_s4, %s3393_s10  ;;  %s3940_s1 = scalar_lea.hbm %s5471_s4, 1024 }
  0x36   : > { %s3935_s17 = scalar_lea.hbm %s4303_s13, 256  ;;  %p3941_p6 = scmp.lt.s32.totalorder %s4303_s13, %s5471_s4 }
  0x37   : > { %p3936_p2 = scmp.ne.s32.totalorder %s4303_s13, %s3935_s17  ;;  %p3942_p7 = scmp.lt.s32.totalorder %s3940_s1, %s3935_s17 }
  0x39   : > { %p3938_p4 = pnand %p4315_p3, %p3936_p2  ;;  %p3943_p8 = por %p3942_p7, %p3941_p6 }
  0x3b   : > { %p3939_p5 = pneg %p3938_p4 }
  0x3d   : > { %p3944_p9 = pnand %p3943_p8, %p3939_p5 }
  0x3f   : > { %3947 = shalt.err (!%p3944_p9)
}
  0x40   : > { %s3948_s28 = scalar_lea.vmem %s4307_s15, 256  ;;  %s4180_s11 = smov [#allocation9]  }
  0x41   : > { %p3949_p11 = scmp.ne.s32.totalorder %s4307_s15, %s3948_s28  ;;  %s3953_s12 = sshll.u32 %s4180_s11, 4  ;;  %s3954_s12 = int_to_ptr.vmem [resolvable:$false] %s3953_s12 }
  0x42   : > { %s3955_s14 = scalar_lea.vmem %s3954_s12, 512  ;;  %p3956_p0 = scmp.lt.s32.totalorder %s4307_s15, %s3954_s12 }
  0x43   : > { %p3951_p12 = pnand %p3949_p11, %p4315_p3  ;;  %p3957_p2 = scmp.lt.s32.totalorder %s3955_s14, %s3948_s28 }
  0x45   : > { %p3952_p13 = pneg %p3951_p12  ;;  %p3958_p4 = por %p3957_p2, %p3956_p0 }
  0x47   : > { %p3959_p10 = pnand %p3958_p4, %p3952_p13 }
  0x49   : > { %3962 = shalt.err (!%p3959_p10)
}
  0x4a   : > { %s5449_s17 = smov 128   ;;  %s5451_s19 = smov 8  }
  0x4b   : > { %3762 = dma.hbm_to_vmem [thread:$0]  (!%p4293_p1), %s4303_s13, 256, %s4307_s15, %s4309_s16, %s5449_s17, %s5449_s17, %s5451_s19  }
  0x4c   : > { %s4346_s24 = scalar_lea.hbm %s5440_s5, %s3393_s10  ;;  %s4349_s25 = sadd.s32 4294967295, %s4175_s22  }
  0x4d   : > { %s5448_s28 = sadd.s32 4294967294, %s4175_s22   ;;  %p65_p10 = scmp.ne.s32.totalorder %s4167_s20, %s4163_s2 }
  0x4e   : > { %p5454_p5 = scmp.eq.s32.totalorder %s4349_s25, 0  ;;  %p162_p6 = scmp.eq.s32.totalorder %s4349_s25, 3 }
  0x4f   : > { %p168_p7 = scmp.eq.s32.totalorder %s5448_s28, 3  ;;  %p3324_p9 = scmp.ge.s32.totalorder %s4175_s22, 1 }
  0x50   : > { %p4360_p8 = por %p5454_p5, %p65_p10  ;;  %p5474_p11 = scmp.ne.s32.totalorder %s4171_s21, %s4167_s20 }
  0x51   : > { %p4372_p13 = por %p168_p7, %p65_p10  ;;  %p227_p0 = scmp.lt.s32.totalorder %s4175_s22, 5 }
  0x52   : > { %s5473_s13 = scalar_select %p4360_p8, 1, 0 }
  0x53   : > { %p4368_p12 = por %p162_p6, %p5474_p11  ;;  %s300_s11 = scalar_lea.vmem [#allocation11], %s3331_s29 }
  0x54   : > { %s5476_s15 = scalar_select %p4372_p13, 1, 0 }
  0x55   : > { %s5475_s10 = scalar_select %p4368_p12, 1, 0 }
  0x56   : > { %5477 = sst [smem:[#allocation29_spill]] %s5476_s15  ;;  %s307_s12 = sshll.u32 %s300_s11, 4  ;;  %s4400_s12 = int_to_ptr.vmem [resolvable:$true] %s307_s12 }
  0x57   : > { %p4379_p2 = pnand %p3324_p9, %p227_p0  ;;  %s4183_s0 = smov [#allocation12]  }
  0x58   : > { %s239_s1 = sshll.u32 %s4183_s0, 4  ;;  %s3327_s28 = sshll.u32 %s4289_s27, 5  ;;  %s240_s1 = int_to_ptr.vmem [resolvable:$true] %s239_s1 }
  0x59   : > { %s5478_s14 = scalar_select %p4379_p2, 1, 0 }
  0x5a   : > { %p3752_p4 = pneg %p4379_p2  ;;  %s3392_s17 = sshll.u32 %s4175_s22, 9 }
  0x5b   : > { %s257_s19 = scalar_lea.vmem [#allocation6], %s3327_s28  ;;  %s4396_s21 = scalar_lea.hbm %s5438_s3, %s3392_s17 }
  0x5c   : > { %s265_s4 = sshll.u32 %s257_s19, 4  ;;  %p4389_p10 = pnand %p3752_p4, %p5454_p5  ;;  %s4398_s4 = int_to_ptr.vmem [resolvable:$true] %s265_s4 }
  0x5d   : > { %s3974_s28 = scalar_lea.vmem %s240_s1, 256  ;;  %p3982_p0 = scmp.lt.s32.totalorder %s240_s1, %s240_s1 }
  0x5e   : > { %p3965_p6 = pneg %p4389_p10  ;;  %p3975_p7 = scmp.ne.s32.totalorder %s240_s1, %s3974_s28 }
  0x5f   : > { %p3983_p4 = scmp.lt.s32.totalorder %s3974_s28, %s3974_s28 }
  0x60   : > { %p3977_p9 = pnand %p3975_p7, %p3965_p6 }
  0x61   : > { %p3984_p5 = por %p3983_p4, %p3982_p0 }
  0x62   : > { %p3978_p11 = pneg %p3977_p9 }
  0x64   : > { %p3985_p13 = pnand %p3984_p5, %p3978_p11 }
  0x66   : > { %3988 = shalt.err (!%p3985_p13)
}
  0x67   : > { %s5480_s19 = smov 8   ;;  %s5481_s17 = smov 128  }
  0x68   : > { %3755 = dma.hbm_to_vmem [thread:$0]  (!%p4389_p10), %s5441_s6, 256, %s240_s1, [#allocation13], %s5481_s17, %s5481_s17, %s5480_s19  }
  0x69   : > { %s254_s11 = scalar_lea.sflag [#allocation7], %s4289_s27  ;;  %s3989_s23 = scalar_lea.hbm %s4396_s21, 512 }
  0x6a   : > { %p3990_p6 = scmp.ne.s32.totalorder %s4396_s21, %s3989_s23  ;;  %s3994_s15 = scalar_lea.hbm %s5438_s3, 2048 }
  0x6b   : > { %p3995_p7 = scmp.lt.s32.totalorder %s4396_s21, %s5438_s3  ;;  %p3996_p9 = scmp.lt.s32.totalorder %s3994_s15, %s3989_s23 }
  0x6c   : > { %p3992_p5 = pnand %p3990_p6, %p4315_p3 }
  0x6d   : > { %p3997_p11 = por %p3996_p9, %p3995_p7 }
  0x6e   : > { %p3993_p13 = pneg %p3992_p5 }
  0x70   : > { %p3998_p0 = pnand %p3997_p11, %p3993_p13 }
  0x72   : > { %4001 = shalt.err (!%p3998_p0)
}
  0x73   : > { %s4002_s27 = scalar_lea.vmem %s4398_s4, 512  ;;  %s4184_s1 = smov [#allocation6]  }
  0x74   : > { %p4003_p10 = scmp.ne.s32.totalorder %s4398_s4, %s4002_s27  ;;  %s4007_s0 = sshll.u32 %s4184_s1, 4  ;;  %s4008_s0 = int_to_ptr.vmem [resolvable:$false] %s4007_s0 }
  0x75   : > { %s4009_s29 = scalar_lea.vmem %s4008_s0, 1024  ;;  %p4010_p5 = scmp.lt.s32.totalorder %s4398_s4, %s4008_s0 }
  0x76   : > { %p4005_p4 = pnand %p4003_p10, %p4315_p3  ;;  %p4011_p12 = scmp.lt.s32.totalorder %s4009_s29, %s4002_s27 }
  0x78   : > { %p4006_p6 = pneg %p4005_p4  ;;  %p4012_p8 = por %p4011_p12, %p4010_p5 }
  0x7a   : > { %p4013_p2 = pnand %p4012_p8, %p4006_p6 }
  0x7c   : > { %4016 = shalt.err (!%p4013_p2)
}
  0x7d   : > { %3759 = dma.hbm_to_vmem [thread:$0]  (!%p4293_p1), %s4396_s21, 512, %s4398_s4, %s254_s11, %s5481_s17, %s5481_s17, %s5480_s19  }
  0x7e   : > { %s4017_s2 = scalar_lea.hbm %s4346_s24, 256  ;;  %s4022_s15 = scalar_lea.hbm %s5440_s5, 1024 }
  0x7f   : > { %p4018_p13 = scmp.ne.s32.totalorder %s4346_s24, %s4017_s2  ;;  %p4023_p8 = scmp.lt.s32.totalorder %s4346_s24, %s5440_s5 }
  0x80   : > { %p4024_p12 = scmp.lt.s32.totalorder %s4022_s15, %s4017_s2 }
  0x81   : > { %p4020_p7 = pnand %p4018_p13, %p4315_p3 }
  0x82   : > { %p4025_p2 = por %p4024_p12, %p4023_p8 }
  0x83   : > { %p4021_p9 = pneg %p4020_p7 }
  0x85   : > { %p4026_p11 = pnand %p4025_p2, %p4021_p9 }
  0x87   : > { %4029 = shalt.err (!%p4026_p11)
}
  0x88   : > { %s4030_s4 = scalar_lea.vmem %s4400_s12, 256  ;;  %s4185_s21 = smov [#allocation11]  }
  0x89   : > { %p4031_p0 = scmp.ne.s32.totalorder %s4400_s12, %s4030_s4  ;;  %s4035_s11 = sshll.u32 %s4185_s21, 4  ;;  %s4036_s11 = int_to_ptr.vmem [resolvable:$false] %s4035_s11 }
  0x8a   : > { %s4037_s27 = scalar_lea.vmem %s4036_s11, 512  ;;  %p4038_p6 = scmp.lt.s32.totalorder %s4400_s12, %s4036_s11 }
  0x8b   : > { %p4033_p10 = pnand %p4031_p0, %p4315_p3  ;;  %p4039_p5 = scmp.lt.s32.totalorder %s4037_s27, %s4030_s4 }
  0x8d   : > { %p4034_p4 = pneg %p4033_p10  ;;  %p4040_p13 = por %p4039_p5, %p4038_p6 }
  0x8f   : > { %p4041_p7 = pnand %p4040_p13, %p4034_p4 }
  0x91   : > { %4044 = shalt.err (!%p4041_p7)
}
  0x92   : > { %3765 = dma.hbm_to_vmem [thread:$0]  (!%p4293_p1), %s4346_s24, 256, %s4400_s12, %s4309_s16, %s5481_s17, %s5481_s17, %s5480_s19  }
  0x93   : > { %p5482_p3 = scmp.ne.s32.totalorder %s5478_s14, 0 }
  0x94   : > { %s4463_s18 = sand.u32 (!%p5482_p3), 1, %s4167_s20   ;;  %p5483_p9 = scmp.ne.s32.totalorder (!%p5482_p3), %s5473_s13, 0 }
  0x95   : > { %319 = sbr.rel (%p5482_p3) target bundleno = 1303 (0x517), region = 36  ;;  %s3338_s1 = sshll.u32 (!%p5482_p3), %s4463_s18, 5 }
  0x96   : > { %s322_s0 = scalar_lea.sflag (!%p5482_p3), [#allocation7], %s4463_s18  ;;  %s4467_s29 = scalar_lea.vmem (!%p5482_p3), [#allocation6], %s3338_s1 }
  0x9a   : > { %4142 = dma.done.wait (%p5483_p9), %s322_s0, 512  }
  0x9b   : > { %4144 = vsyncadd (%p5483_p9), %s322_s0, 4294966784  ;;  %s330_s30 = sand.u32 1, %s4349_s25   ;;  %s3339_s16 = sshll.u32 %s4463_s18, 4 }
  0x9c   : > { %s331_s24 = scalar_lea.sflag [#allocation10], %s330_s30  ;;  %s334_s12 = scalar_lea.vmem [#allocation9], %s3339_s16 }
  0x9d   : > { %4146 = dma.done.wait (%p5483_p9), %s331_s24, 512  }
  0x9e   : > { %4148 = vsyncadd (%p5483_p9), %s331_s24, 4294966784  ;;  %s343_s14 = scalar_lea.vmem [#allocation11], %s3339_s16  ;;  %p5484_p1 = scmp.eq.s32.totalorder %s4349_s25, 0 }
  0xa0   : > { %4150 = dma.done.wait (%p5484_p1), [#allocation13], 256   ;;  %p5485_p8 = pmov %p5484_p1 }
  0xa1   : > { %v433_v0 = vlaneseq  ;;  %v4186_v1 = vmov 0.0   ;;  %vm4187_vm0 = vmmov 0   ;;  %s3732_s13 = smul.u32 144, %s4463_s18  ;;  %v4499_v6 = vld [vmem:[%s334_s12] sm:$0xff]  ;;  %v4513_v12 = vld [vmem:[%s334_s12 + $0x8] sm:$0xff]  ;;  %s3342_s23 = sshll.u32 %s4349_s25, 1 }
  0xa2   : > { %4152 = vsyncadd (%p5485_p8), [#allocation13], 4294967040  ;;  %3479 = vmatprep.subr.bf16.mxu0 %v4186_v1  ;;  %3485 = vmatprep.subr.bf16.mxu1 %v4186_v1  ;;  %s3731_s19 = smul.u32 288, %s4463_s18  ;;  %v4501_v7 = vld [vmem:[#allocation12] sm:$0xff]  ;;  %v411_v13 = vld [vmem:[%s343_s14 + $0x8] sm:$0xff]  ;;  %v4517_v14 = vpack.c.bf16 %v4499_v6, %v4499_v6  ;;  %v4527_v16 = vpack.c.bf16 %v4513_v12, %v4513_v12  ;;  %s420_s15 = sld [smem:[#allocation3 + %s3342_s23]] }
  0xa3   : > { %v4488_v2 = vshrl.u32 %v433_v0, 7  ;;  %3481 = vmatprep.mubr.msk.bf16.mxu0 %vm4187_vm0, %v4186_v1  ;;  %3487 = vmatprep.mubr.msk.bf16.mxu1 %vm4187_vm0, %v4186_v1  ;;  %v410_v8 = vld [vmem:[%s343_s14] sm:$0xff]  ;;  %s4505_s17 = scalar_lea.vmem [#allocation15], %s3732_s13  ;;  %s4510_s2 = scalar_lea.vmem [#allocation17], %s3732_s13  ;;  %v4530_v17 = vld [vmem:[%s4467_s29 + $0x8] sm:$0xff]  ;;  %v4541_v20 = vld [vmem:[%s4467_s29 + $0x18] sm:$0xff]  ;;  %v4567_v36 = vpack.c.bf16 %v411_v13, %v411_v13 }
  0xa4   : > { %2717 = vst [vmem:[%s4505_s17] sm:$0xff] %v4499_v6  ;;  %3059 = vst [vmem:[%s4510_s2] sm:$0xff] %v410_v8  ;;  %v4520_v15 = vld [vmem:[%s4467_s29] sm:$0xff]  ;;  %s4533_s22 = scalar_lea.vmem [#allocation14], %s3731_s19  ;;  %v4538_v19 = vld [vmem:[%s4467_s29 + $0x10] sm:$0xff]  ;;  %3480 = vmatpush3.bf16.xpose.msra.mxu0 %v4517_v14  ;;  %3486 = vmatpush3.bf16.xpose.msra.mxu1 %v4527_v16  ;;  %v4565_v34 = vpack.c.bf16 %v410_v8, %v410_v8  ;;  %s4624_s28 = sld [smem:[#allocation4 + %s3342_s23]]  ;;  %vm1058_vm5 = vcmask 64512  }
  0xa5   : > { %v492_v3 = vsub.s32 1, %v4488_v2  ;;  %v698_v4 = vsub.s32 4, %v4488_v2  ;;  %v466_v5 = vsub.s32 2, %v4488_v2  ;;  %v894_v9 = vsub.s32 7, %v4488_v2  ;;  %2718 = vst [vmem:[%s4505_s17 + $0x48] sm:$0xff] %v4513_v12  ;;  %3060 = vst [vmem:[%s4510_s2 + $0x48] sm:$0xff] %v411_v13  ;;  %3491 = vmatprep.subr.bf16.mxu0 %v4186_v1  ;;  %3497 = vmatprep.subr.bf16.mxu1 %v4186_v1 }
  0xa6   : > { %2357 = vst [vmem:[%s4533_s22] sm:$0xff] %v4520_v15  ;;  %v672_v21 = vsub.s32 5, %v4488_v2  ;;  %2358 = vst [vmem:[%s4533_s22 + $0x48] sm:$0xff] %v4530_v17  ;;  %v4560_v31 = vsub.s32 0, %v4488_v2  ;;  %v682_v46 = vsub.s32 3, %v4488_v2  ;;  %v3343_v49 = vld [vmem:[#allocation12 + $0x8] ss:$0 sm:$0xff] }
  0xa7   : > { %v493_v10 = vrot.slane %v4501_v7, %v492_v3  ;;  %v699_v11 = vrot.slane %v4501_v7, %v698_v4  ;;  %v467_v18 = vrot.slane %v4501_v7, %v466_v5  ;;  %2359 = vst [vmem:[%s4533_s22 + $0x90] sm:$0xff] %v4538_v19  ;;  %2360 = vst [vmem:[%s4533_s22 + $0xd8] sm:$0xff] %v4541_v20  ;;  %v884_v56 = vsub.s32 6, %v4488_v2  ;;  %s422_s26 = sadd.s32 1, %s3342_s23  ;;  %s429_s11 = sld [smem:[#allocation5 + %s3342_s23]] }
  0xa8   : > { %v895_v25 = vrot.slane %v4501_v7, %v894_v9  ;;  %v673_v33 = vrot.slane %v4501_v7, %v672_v21  ;;  %v477_v39 = vrot.slane %v4501_v7, %v4560_v31  ;;  %v683_v51 = vrot.slane %v4501_v7, %v682_v46  ;;  %s423_s4 = sld [smem:[#allocation3 + %s422_s26]]  ;;  %s3733_s1 = smul.u32 4608, %s4349_s25 }
  0xa9   : > { %v494_v22 = vmul.f32 %v493_v10, %v4499_v6  ;;  %v700_v23 = vmul.f32 %v699_v11, %v410_v8  ;;  %v495_v24 = vmul.f32 %v493_v10, %v4513_v12  ;;  %v468_v26 = vmul.f32 %v467_v18, %v4520_v15  ;;  %s4626_s21 = sld [smem:[#allocation4 + %s422_s26]]  ;;  %s3102_s0 = sshll.u32 %s4533_s22, 4  ;;  %s5301_s0 = int_to_ptr.vmem [resolvable:$true] %s3102_s0 }
  0xaa   : > { %v469_v27 = vmul.f32 %v467_v18, %v4530_v17  ;;  %v701_v28 = vmul.f32 %v699_v11, %v411_v13  ;;  %v470_v29 = vmul.f32 %v467_v18, %v4538_v19  ;;  %v471_v30 = vmul.f32 %v467_v18, %v4541_v20  ;;  %s4633_s27 = sld [smem:[#allocation5 + %s422_s26]]  ;;  %s5299_s24 = scalar_lea.hbm %s5442_s7, %s3733_s1 }
  0xab   : > { %496 = vadd.xlane.f32.xlu0 %v494_v22  ;;  %702 = vadd.xlane.f32.xlu1 %v700_v23  ;;  %v896_v37 = vmul.f32 %v895_v25, %v410_v8  ;;  %v897_v38 = vmul.f32 %v895_v25, %v411_v13  ;;  %v674_v40 = vmul.f32 %v673_v33, %v4520_v15  ;;  %s3078_s12 = scalar_lea.sflag [#allocation8], %s4463_s18  ;;  %s4045_s14 = scalar_lea.vmem %s5301_s0, 4608 }
  0xac   : > { %v472_v32 = vpack.c.bf16 %v469_v27, %v468_v26  ;;  %v473_v35 = vpack.c.bf16 %v471_v30, %v470_v29  ;;  %v675_v41 = vmul.f32 %v673_v33, %v4530_v17  ;;  %v676_v42 = vmul.f32 %v673_v33, %v4538_v19  ;;  %p4046_p12 = scmp.ne.s32.totalorder %s5301_s0, %s4045_s14  ;;  %p5504_p2 = scmp.ne.s32.totalorder %s5475_s10, 0 }
  0xad   : > { %v677_v43 = vmul.f32 %v673_v33, %v4541_v20  ;;  %v479_v44 = vmul.f32 %v477_v39, %v4530_v17  ;;  %v478_v45 = vmul.f32 %v477_v39, %v4520_v15  ;;  %v481_v50 = vmul.f32 %v477_v39, %v4541_v20  ;;  %s4188_s13 = smov [#allocation14]  }
  0xae   : > { %3482 = vmatmul.mubr.bf16.vlgmr.msra.gmra.mxu0 %v472_v32  ;;  %3488 = vmatmul.mubr.bf16.vlgmr.msra.gmra.mxu1 %v473_v35  ;;  %v678_v47 = vpack.c.bf16 %v675_v41, %v674_v40  ;;  %v878_v52 = vmul.f32 %v3343_v49, %v4499_v6  ;;  %v480_v53 = vmul.f32 %v477_v39, %v4538_v19  ;;  %p4047_p11 = pnand %p4046_p12, %p5504_p2  ;;  %s4049_s19 = sshll.u32 %s4188_s13, 4  ;;  %s4050_s19 = int_to_ptr.vmem [resolvable:$false] %s4049_s19 }
  0xaf   : > { %498 = vadd.xlane.f32.xlu0 %v495_v24  ;;  %704 = vadd.xlane.f32.xlu1 %v701_v28  ;;  %v679_v48 = vpack.c.bf16 %v677_v43, %v676_v42  ;;  %v879_v54 = vmul.f32 %v3343_v49, %v4513_v12  ;;  %v685_v55 = vmul.f32 %v683_v51, %v4530_v17  ;;  %v426_v49 = vstv %s4624_s28  ;;  %s4051_s23 = scalar_lea.vmem %s4050_s19, 9216  ;;  %p4052_p10 = scmp.lt.s32.totalorder %s5301_s0, %s4050_s19 }
  0xb0   : > { %3492 = vmatpush3.bf16.xpose.msra.mxu0 %v4565_v34  ;;  %3498 = vmatpush3.bf16.xpose.msra.mxu1 %v4567_v36  ;;  %v880_v57 = vpack.c.bf16 %v878_v52, %v878_v52  ;;  %v684_v58 = vmul.f32 %v683_v51, %v4520_v15  ;;  %v687_v60 = vmul.f32 %v683_v51, %v4541_v20  ;;  %p4048_p0 = pneg %p4047_p11  ;;  %p4053_p4 = scmp.lt.s32.totalorder %s4051_s23, %s4045_s14 }
  0xb1   : > { %3493 = vmatprep.mubr.msk.bf16.mxu0 %vm4187_vm0, %v4186_v1  ;;  %3499 = vmatprep.mubr.msk.bf16.mxu1 %vm4187_vm0, %v4186_v1  ;;  %v881_v59 = vpack.c.bf16 %v879_v54, %v879_v54  ;;  %v885_v61 = vrot.slane %v4501_v7, %v884_v56  ;;  %v686_v62 = vmul.f32 %v683_v51, %v4538_v19 }
  0xb2   : > { %3509 = vmatprep.subr.bf16.mxu1 %v4186_v1  ;;  %3503 = vmatprep.subr.bf16.mxu0 %v4186_v1  ;;  %p4054_p6 = por %p4053_p4, %p4052_p10 }
  0xb3   : > { %898 = vadd.xlane.f32.xlu0 %v896_v37  ;;  %900 = vadd.xlane.f32.xlu1 %v897_v38  ;;  %v887_v63 = vmul.f32 %v885_v61, %v4513_v12  ;;  %v886_v3 = vmul.f32 %v885_v61, %v4499_v6 }
  0xb4   : > { %p4055_p5 = pnand %p4054_p6, %p4048_p0 }
  0xb7   : > { %484 = vadd.xlane.f32.xlu1 %v479_v44  ;;  %482 = vadd.xlane.f32.xlu0 %v478_v45 }
  0xb8   : > { %3494 = vmatmul.mubr.bf16.vlgmr.msra.gmra.mxu0 %v678_v47  ;;  %3500 = vmatmul.mubr.bf16.vlgmr.msra.gmra.mxu1 %v679_v48  ;;  %v443_v47 = vand.u32 127, %v433_v0  ;;  %v421_v48 = vstv %s420_s15  ;;  %v424_v0 = vstv %s423_s4 }
  0xb9   : > { %3504 = vmatpush3.bf16.xpose.msra.mxu0 %v4565_v34  ;;  %3510 = vmatpush3.bf16.xpose.msra.mxu1 %v4567_v36  ;;  %vm4636_vm1 = vcmp.lt.s32.totalorder %v4488_v2, %v421_v48  ;;  %vm4661_vm7 = vcmp.lt.s32.totalorder %v4488_v2, %v424_v0 }
  0xba   : > { %3511 = vmatprep.mubr.msk.bf16.mxu1 %vm4187_vm0, %v4186_v1  ;;  %3505 = vmatprep.mubr.msk.bf16.mxu0 %vm4187_vm0, %v4186_v1  ;;  %vm4640_vm2 = vcmp.lt.s32.totalorder %v443_v47, %v426_v49 }
  0xbb   : > { %488 = vadd.xlane.f32.xlu1 %v481_v50  ;;  %486 = vadd.xlane.f32.xlu0 %v480_v53  ;;  %v435_v50 = vadd.s32 8, %v4488_v2  ;;  %vm460_vm4 = vmand %vm4636_vm1, %vm4640_vm2 }
  0xbc   : > { %3515 = vmatprep.subr.bf16.mxu0 %v4186_v1  ;;  %3521 = vmatprep.subr.bf16.mxu1 %v4186_v1 }
  0xbd   : > { %vm4644_vm3 = vcmp.lt.s32.totalorder %v435_v50, %v421_v48  ;;  %vm4675_vm10 = vcmp.lt.s32.totalorder %v435_v50, %v424_v0 }
  0xbe   : > { %vm461_vm6 = vmand %vm4644_vm3, %vm4640_vm2 }
  0xbf   : > { %690 = vadd.xlane.f32.xlu1 %v685_v55  ;;  %688 = vadd.xlane.f32.xlu0 %v684_v58  ;;  %v428_v55 = vstv %s4626_s21  ;;  %v430_v58 = vstv %s429_s11 }
  0xc0   : > { %3506 = vmatmul.mubr.bf16.vlgmr.msra.gmra.mxu0 %v880_v57  ;;  %3512 = vmatmul.mubr.bf16.vlgmr.msra.gmra.mxu1 %v881_v59  ;;  %vm4667_vm8 = vcmp.lt.s32.totalorder %v443_v47, %v428_v55  ;;  %vm4671_vm9 = vcmp.lt.s32.totalorder %v443_v47, %v430_v58 }
  0xc1   : > { %3517 = vmatprep.mubr.msk.bf16.mxu0 %vm4187_vm0, %v4186_v1  ;;  %3523 = vmatprep.mubr.msk.bf16.mxu1 %vm4187_vm0, %v4186_v1  ;;  %vm462_vm11 = vmand %vm4661_vm7, %vm4667_vm8 }
  0xc2   : > { %vm666_vm12 = vmand %vm4636_vm1, %vm4671_vm9  ;;  %vm4734_vm1 = vcmp.lt.s32.totalorder %v4488_v2, %v426_v49 }
  0xc3   : > { %694 = vadd.xlane.f32.xlu1 %v687_v60  ;;  %692 = vadd.xlane.f32.xlu0 %v686_v62  ;;  %vm463_vm14 = vmand %vm4675_vm10, %vm4667_vm8  ;;  %vm1358_vm8 = vcmask 1043456  }
  0xc4   : > { %vm667_vm2 = vmand %vm4644_vm3, %vm4671_vm9 }
  0xc7   : > { %890 = vadd.xlane.f32.xlu1 %v887_v63  ;;  %888 = vadd.xlane.f32.xlu0 %v886_v3 }
 0x134   : > { %v497_v4 = vpop.xlane.xlu0 %496  ;;  %v703_v5 = vpop.xlane.xlu1 %702 }
 0x135   : > { %582 = vxpose.xlu0.b32.start.end [1/1] (short) (narrow) %v497_v4, 8 }
 0x138   : > { %v499_v7 = vpop.xlane.xlu0 %498  ;;  %v705_v8 = vpop.xlane.xlu1 %704 }
 0x139   : > { %614 = vxpose.xlu1.b32.start.end [1/1] (short) (narrow) %v499_v7, 8  ;;  %788 = vxpose.xlu0.b32.start.end [1/1] (short) (narrow) %v703_v5, 8 }
 0x13c   : > { %v899_v9 = vpop.xlane.xlu0 %898  ;;  %v901_v10 = vpop.xlane.xlu1 %900 }
 0x13d   : > { %982 = vxpose.xlu1.b32.start.end [1/1] (short) (narrow) %v899_v9, 8  ;;  %820 = vxpose.xlu0.b32.start.end [1/1] (short) (narrow) %v705_v8, 8 }
 0x140   : > { %v483_v39 = vpop.xlane.xlu0 %482  ;;  %v485_v40 = vpop.xlane.xlu1 %484 }
 0x141   : > { %1014 = vxpose.xlu0.b32.start.end [1/1] (short) (narrow) %v901_v10, 8 }
 0x144   : > { %v487_v41 = vpop.xlane.xlu0 %486  ;;  %v489_v42 = vpop.xlane.xlu1 %488 }
 0x148   : > { %v689_v43 = vpop.xlane.xlu0 %688  ;;  %v691_v44 = vpop.xlane.xlu1 %690 }
 0x14c   : > { %v693_v45 = vpop.xlane.xlu0 %692  ;;  %v4628_v46 = vpop.xlane.xlu1 %694 }
 0x150   : > { %v889_v51 = vpop.xlane.xlu0 %888  ;;  %v4649_v56 = vpop.xlane.xlu1 %890 }
 0x16e   : > { %v534_v11 = vpop.f32.mrf.mxu0  ;;  %v4611_v13 = vpop.f32.mrf.mxu1 }
 0x16f   : > { %v535_v60 = vadd.f32 %v534_v11, %v483_v39  ;;  %v576_v9 = vadd.f32 %v4611_v13, %v487_v41 }
 0x170   : > { %v3483_v12 = vpop.f32.mrf.mxu0  ;;  %v3489_v15 = vpop.f32.mrf.mxu1 }
 0x171   : > { %v432_v15 = vstv %s4633_s27 }
 0x172   : > { %v537_v6 = vpop.f32.mrf.mxu0  ;;  %v578_v17 = vpop.f32.mrf.mxu1  ;;  %vm4709_vm13 = vcmp.lt.s32.totalorder %v443_v47, %v432_v15 }
 0x173   : > { %v538_v59 = vadd.f32 %v537_v6, %v485_v40  ;;  %v579_v8 = vadd.f32 %v578_v17, %v489_v42  ;;  %vm668_vm15 = vmand %vm4661_vm7, %vm4709_vm13 }
 0x174   : > { %v3484_v18 = vpop.f32.mrf.mxu0  ;;  %v3490_v19 = vpop.f32.mrf.mxu1  ;;  %vm669_vm3 = vmand %vm4675_vm10, %vm4709_vm13 }
 0x178   : > { %v740_v20 = vpop.f32.mrf.mxu0  ;;  %v4613_v21 = vpop.f32.mrf.mxu1 }
 0x179   : > { %v741_v10 = vadd.f32 %v740_v20, %v689_v43 }
 0x17a   : > { %v3495_v22 = vpop.f32.mrf.mxu0  ;;  %v3501_v23 = vpop.f32.mrf.mxu1 }
 0x17c   : > { %v4615_v24 = vpop.f32.mrf.mxu0  ;;  %v4617_v25 = vpop.f32.mrf.mxu1 }
 0x17d   : > { %v785_v48 = vadd.f32 %v4617_v25, %v4628_v46 }
 0x17e   : > { %v3496_v26 = vpop.f32.mrf.mxu0  ;;  %v3502_v27 = vpop.f32.mrf.mxu1 }
 0x180   : > { %v4619_v28 = vpop.f32.mrf.mxu0  ;;  %v4621_v29 = vpop.f32.mrf.mxu1 }
 0x181   : > { %v977_v25 = vadd.f32 %v4621_v29, %v4649_v56 }
 0x182   : > { %v3507_v30 = vpop.f32.mrf.mxu0  ;;  %v3513_v32 = vpop.f32.mrf.mxu1 }
 0x183   : > { %v744_v30 = vadd.f32 %v4615_v24, %v691_v44  ;;  %v782_v32 = vadd.f32 %v4613_v21, %v693_v45  ;;  %v937_v21 = vadd.f32 %v4619_v28, %v889_v51 }
 0x184   : > { %v939_v33 = vpop.f32.mrf.mxu0  ;;  %v979_v35 = vpop.f32.mrf.mxu1 }
 0x186   : > { %v3508_v37 = vpop.f32.mrf.mxu0  ;;  %v3514_v38 = vpop.f32.mrf.mxu1 }
 0x1b1   : > { %v598_v57 = vpop.trf.xlu0 }
 0x1b2   : > { %v649_v61 = vrot.slane %v598_v57, %v4560_v31 }
 0x1b4   : > { %v654_v3 = vadd.f32 %v649_v61, %v535_v60  ;;  %v655_v4 = vadd.f32 %v649_v61, %v538_v59 }
 0x1b5   : > { %v630_v11 = vpop.trf.xlu1  ;;  %v804_v12 = vpop.trf.xlu0 }
 0x1b6   : > { %v653_v6 = vrot.slane %v630_v11, %v4560_v31  ;;  %v855_v18 = vrot.slane %v804_v12, %v4560_v31  ;;  %v4688_v19 = vsel %vm460_vm4, %v654_v3, -1e+09  ;;  %v4695_v13 = vsel %vm461_vm6, %v655_v4, -1e+09  ;;  %vm872_vm4 = vmand %vm4734_vm1, %vm4671_vm9 }
 0x1b7   : > { %v1059_v17 = vsel %vm1058_vm5, %v4688_v19, -inf  ;;  %v1062_v20 = vsel %vm1058_vm5, %v4695_v13, -inf  ;;  %vm441_vm6 = vcmp.lt.s32.totalorder %v4488_v2, %v428_v55 }
 0x1b8   : > { %v656_v22 = vadd.f32 %v653_v6, %v576_v9  ;;  %v657_v23 = vadd.f32 %v653_v6, %v579_v8  ;;  %v860_v26 = vadd.f32 %v855_v18, %v741_v10  ;;  %1060 = vmax.xlane.f32.xlu1 %v1059_v17  ;;  %1063 = vmax.xlane.f32.xlu0 %v1062_v20  ;;  %vm873_vm7 = vmand %vm441_vm6, %vm4709_vm13 }
 0x1b9   : > { %v998_v33 = vpop.trf.xlu1  ;;  %v836_v35 = vpop.trf.xlu0  ;;  %v861_v43 = vadd.f32 %v855_v18, %v744_v30 }
 0x1ba   : > { %v1049_v37 = vrot.slane %v998_v33, %v4560_v31  ;;  %v859_v38 = vrot.slane %v836_v35, %v4560_v31  ;;  %v660_v24 = vsel %vm462_vm11, %v656_v22, -1e+09  ;;  %v864_v39 = vsel %vm666_vm12, %v860_v26, -1e+09 }
 0x1bb   : > { %v1065_v40 = vsel %vm1058_vm5, %v660_v24, -inf  ;;  %v1167_v41 = vsel %vm1058_vm5, %v864_v39, -inf  ;;  %v661_v45 = vsel %vm463_vm14, %v657_v23, -1e+09  ;;  %v865_v0 = vsel %vm667_vm2, %v861_v43, -1e+09 }
 0x1bc   : > { %v862_v44 = vadd.f32 %v859_v38, %v782_v32  ;;  %1066 = vmax.xlane.f32.xlu1 %v1065_v40  ;;  %v1054_v47 = vadd.f32 %v1049_v37, %v937_v21  ;;  %1168 = vmax.xlane.f32.xlu0 %v1167_v41  ;;  %v1068_v50 = vsel %vm1058_vm5, %v661_v45, -inf  ;;  %v863_v52 = vadd.f32 %v859_v38, %v785_v48 }
 0x1bd   : > { %v1030_v28 = vpop.trf.xlu0  ;;  %v1170_v46 = vsel %vm1058_vm5, %v865_v0, -inf }
 0x1be   : > { %v866_v49 = vsel %vm668_vm15, %v862_v44, -1e+09  ;;  %v1053_v53 = vrot.slane %v1030_v28, %v4560_v31  ;;  %v1056_v54 = vsel %vm872_vm4, %v1054_v47, -1e+09  ;;  %v4762_v58 = vsel %vm669_vm3, %v863_v52, -1e+09 }
 0x1bf   : > { %v1173_v51 = vsel %vm1058_vm5, %v866_v49, -inf  ;;  %v1275_v31 = vsel %vm1058_vm5, %v1056_v54, -inf  ;;  %v1176_v59 = vsel %vm1058_vm5, %v4762_v58, -inf  ;;  %vm1466_vm15 = vcmask 130048  }
 0x1c0   : > { %1069 = vmax.xlane.f32.xlu1 %v1068_v50  ;;  %1174 = vmax.xlane.f32.xlu0 %v1173_v51  ;;  %v1055_v57 = vadd.f32 %v1053_v53, %v977_v25 }
 0x1c2   : > { %v4768_v29 = vsel %vm873_vm7, %v1055_v57, -1e+09 }
 0x1c3   : > { %v1278_v2 = vsel %vm1058_vm5, %v4768_v29, -inf }
 0x1c4   : > { %1171 = vmax.xlane.f32.xlu1 %v1170_v46  ;;  %1276 = vmax.xlane.f32.xlu0 %v1275_v31 }
 0x1c8   : > { %1177 = vmax.xlane.f32.xlu1 %v1176_v59 }
 0x1cc   : > { %1279 = vmax.xlane.f32.xlu1 %v1278_v2 }
 0x241   : > { %v1061_v55 = vpop.xlane.xlu1 %1060  ;;  %v1064_v60 = vpop.xlane.xlu0 %1063 }
 0x242   : > { %v1071_v56 = vsub.f32 %v4688_v19, %v1061_v55  ;;  %v1072_v61 = vsub.f32 %v4695_v13, %v1064_v60  ;;  %v1103_v62 = vmax.f32 %v1061_v55, %v1064_v60 }
 0x244   : > { %v1075_v63 = vmul.f32 1.442695, %v1071_v56  ;;  %v1077_v3 = vmul.f32 1.442695, %v1072_v61  ;;  %v1104_v4 = vrot.slane %v1103_v62, 4 }
 0x245   : > { %v4774_v5 = vpop.xlane.xlu1 %1066  ;;  %v4777_v8 = vpop.xlane.xlu0 %1168 }
 0x246   : > { %3823 = vpow2.f32 %v1075_v63  ;;  %v1073_v7 = vsub.f32 %v660_v24, %v4774_v5  ;;  %v1105_v9 = vmax.f32 %v1103_v62, %v1104_v4  ;;  %v1179_v10 = vsub.f32 %v864_v39, %v4777_v8 }
 0x247   : > { %3825 = vpow2.f32 %v1077_v3 }
 0x248   : > { %v1079_v11 = vmul.f32 1.442695, %v1073_v7  ;;  %v1106_v12 = vrot.slane %v1105_v9, 2  ;;  %v1183_v15 = vmul.f32 1.442695, %v1179_v10 }
 0x249   : > { %v4780_v6 = vpop.xlane.xlu1 %1069  ;;  %v4785_v13 = vpop.xlane.xlu0 %1174 }
 0x24a   : > { %3827 = vpow2.f32 %v1079_v11  ;;  %v1074_v18 = vsub.f32 %v661_v45, %v4780_v6  ;;  %v1110_v19 = vmax.f32 %v4774_v5, %v4780_v6  ;;  %v1107_v17 = vmax.f32 %v1105_v9, %v1106_v12 }
 0x24b   : > { %3829 = vpow2.f32 %v1183_v15  ;;  %v1181_v20 = vsub.f32 %v866_v49, %v4785_v13 }
 0x24c   : > { %v1081_v22 = vmul.f32 1.442695, %v1074_v18  ;;  %v1111_v23 = vrot.slane %v1110_v19, 4  ;;  %v1108_v26 = vrot.slane %v1107_v17, 1 }
 0x24d   : > { %v1187_v27 = vmul.f32 1.442695, %v1181_v20  ;;  %v4788_v30 = vpop.xlane.xlu1 %1171  ;;  %v4793_v37 = vpop.xlane.xlu0 %1276 }
 0x24e   : > { %3831 = vpow2.f32 %v1081_v22  ;;  %v1112_v32 = vmax.f32 %v1110_v19, %v1111_v23  ;;  %v1180_v33 = vsub.f32 %v865_v0, %v4788_v30  ;;  %v1211_v35 = vmax.f32 %v4777_v8, %v4788_v30 }
 0x24f   : > { %v1109_v38 = vmax.f32 %v1107_v17, %v1108_v26  ;;  %v1281_v24 = vsub.f32 %v1056_v54, %v4793_v37  ;;  %v1297_v39 = vrot.slane %v4793_v37, 4  ;;  %3833 = vpow2.f32 %v1187_v27 }
 0x250   : > { %v1113_v21 = vrot.slane %v1112_v32, 2  ;;  %v1185_v40 = vmul.f32 1.442695, %v1180_v33  ;;  %v1212_v41 = vrot.slane %v1211_v35, 4 }
 0x251   : > { %v1117_v42 = vsub.f32 %v1061_v55, %v1109_v38  ;;  %v1118_v43 = vsub.f32 %v1064_v60, %v1109_v38  ;;  %v1283_v44 = vmul.f32 1.442695, %v1281_v24  ;;  %v1298_v45 = vmax.f32 %v4793_v37, %v1297_v39  ;;  %v4798_v47 = vpop.xlane.xlu1 %1177 }
 0x252   : > { %v1114_v28 = vmax.f32 %v1112_v32, %v1113_v21  ;;  %3835 = vpow2.f32 %v1185_v40  ;;  %v1213_v48 = vmax.f32 %v1211_v35, %v1212_v41  ;;  %v1182_v49 = vsub.f32 %v4762_v58, %v4798_v47 }
 0x253   : > { %v4802_v50 = vpop.eup %3823  ;;  %v1121_v51 = vmul.f32 1.442695, %v1117_v42  ;;  %v1123_v52 = vmul.f32 1.442695, %v1118_v43  ;;  %3837 = vpow2.f32 %v1283_v44  ;;  %v1299_v53 = vrot.slane %v1298_v45, 2 }
 0x254   : > { %v4804_v0 = vpop.eup %3825  ;;  %v1115_v54 = vrot.slane %v1114_v28, 1  ;;  %v1214_v25 = vrot.slane %v1213_v48, 2  ;;  %v1189_v46 = vmul.f32 1.442695, %v1182_v49  ;;  %v1218_v57 = vmax.f32 %v4785_v13, %v4798_v47 }
 0x255   : > { %3839 = vpow2.f32 %v1121_v51  ;;  %v1300_v31 = vmax.f32 %v1298_v45, %v1299_v53  ;;  %v1086_v59 = vsel %vm1058_vm5, %v4804_v0, 0.0  ;;  %v4810_v58 = vpop.xlane.xlu1 %1279  ;;  %v1083_v2 = vsel %vm1058_vm5, %v4802_v50, 0.0 }
 0x256   : > { %3841 = vpow2.f32 %v1123_v52  ;;  %v1116_v55 = vmax.f32 %v1114_v28, %v1115_v54  ;;  %v1215_v56 = vmax.f32 %v1213_v48, %v1214_v25  ;;  %v1219_v60 = vrot.slane %v1218_v57, 4  ;;  %1087 = vadd.xlane.f32.xlu1 %v1086_v59  ;;  %1084 = vadd.xlane.f32.xlu0 %v1083_v2 }
 0x257   : > { %v4814_v61 = vpop.eup %3827  ;;  %v1301_v62 = vrot.slane %v1300_v31, 1  ;;  %3843 = vpow2.f32 %v1189_v46  ;;  %v1282_v63 = vsub.f32 %v4768_v29, %v4810_v58  ;;  %v1303_v3 = vrot.slane %v4810_v58, 4 }
 0x258   : > { %v4819_v4 = vpop.eup %3829  ;;  %v1119_v7 = vsub.f32 %v4774_v5, %v1116_v55  ;;  %v1120_v9 = vsub.f32 %v4780_v6, %v1116_v55  ;;  %v1216_v10 = vrot.slane %v1215_v56, 1  ;;  %v1220_v11 = vmax.f32 %v1218_v57, %v1219_v60 }
 0x259   : > { %v1302_v12 = vmax.f32 %v1300_v31, %v1301_v62  ;;  %v1285_v15 = vmul.f32 1.442695, %v1282_v63  ;;  %v1304_v18 = vmax.f32 %v4810_v58, %v1303_v3  ;;  %v1089_v19 = vsel %vm1058_vm5, %v4814_v61, 0.0 }
 0x25a   : > { %v1125_v17 = vmul.f32 1.442695, %v1119_v7  ;;  %v1127_v20 = vmul.f32 1.442695, %v1120_v9  ;;  %v1217_v29 = vmax.f32 %v1215_v56, %v1216_v10  ;;  %v1221_v22 = vrot.slane %v1220_v11, 2  ;;  %1090 = vadd.xlane.f32.xlu0 %v1089_v19 }
 0x25b   : > { %v4826_v23 = vpop.eup %3831  ;;  %v1309_v5 = vsub.f32 %v4793_v37, %v1302_v12  ;;  %3845 = vpow2.f32 %v1285_v15  ;;  %v1305_v6 = vrot.slane %v1304_v18, 2  ;;  %v1191_v26 = vsel %vm1058_vm5, %v4819_v4, 0.0 }
 0x25c   : > { %3847 = vpow2.f32 %v1125_v17  ;;  %v1225_v27 = vsub.f32 %v4777_v8, %v1217_v29  ;;  %v1226_v32 = vsub.f32 %v4788_v30, %v1217_v29  ;;  %v1222_v33 = vmax.f32 %v1220_v11, %v1221_v22  ;;  %v4833_v35 = vpop.eup %3833 }
 0x25d   : > { %3849 = vpow2.f32 %v1127_v20  ;;  %v1311_v38 = vmul.f32 1.442695, %v1309_v5  ;;  %v1306_v24 = vmax.f32 %v1304_v18, %v1305_v6  ;;  %v1092_v39 = vsel %vm1058_vm5, %v4826_v23, 0.0 }
 0x25e   : > { %v1229_v37 = vmul.f32 1.442695, %v1225_v27  ;;  %v1231_v21 = vmul.f32 1.442695, %v1226_v32  ;;  %v1223_v40 = vrot.slane %v1222_v33, 1  ;;  %1093 = vadd.xlane.f32.xlu1 %v1092_v39  ;;  %1192 = vadd.xlane.f32.xlu0 %v1191_v26  ;;  %v1197_v45 = vsel %vm1058_vm5, %v4833_v35, 0.0 }
 0x25f   : > { %v4837_v41 = vpop.eup %3835  ;;  %3851 = vpow2.f32 %v1311_v38  ;;  %v1307_v8 = vrot.slane %v1306_v24, 1  ;;  %v4886_v22 = vsel %vm1358_vm8, %v4517_v14, 0 }
 0x260   : > { %v4839_v42 = vpop.eup %3837  ;;  %3853 = vpow2.f32 %v1229_v37  ;;  %v1224_v30 = vmax.f32 %v1222_v33, %v1223_v40  ;;  %v1194_v43 = vsel %vm1058_vm5, %v4837_v41, 0.0  ;;  %3516 = vmatpush3.bf16.msra.mxu0 %v4886_v22 }
 0x261   : > { %3855 = vpow2.f32 %v1231_v21  ;;  %v1308_v44 = vmax.f32 %v1306_v24, %v1307_v8  ;;  %3527 = vmatprep.subr.bf16.mxu0 %v4186_v1 }
 0x262   : > { %v3840_v28 = vpop.eup %3839  ;;  %v1227_v48 = vsub.f32 %v4785_v13, %v1224_v30  ;;  %v1228_v49 = vsub.f32 %v4798_v47, %v1224_v30  ;;  %1195 = vadd.xlane.f32.xlu1 %v1194_v43  ;;  %1198 = vadd.xlane.f32.xlu0 %v1197_v45  ;;  %v1287_v47 = vsel %vm1058_vm5, %v4839_v42, 0.0 }
 0x263   : > { %v3842_v51 = vpop.eup %3841  ;;  %v1310_v52 = vsub.f32 %v4810_v58, %v1308_v44  ;;  %v4849_v53 = vmul.f32 %v3840_v28, %v4802_v50 }
 0x264   : > { %v4851_v54 = vpop.eup %3843  ;;  %v1233_v25 = vmul.f32 1.442695, %v1227_v48  ;;  %v1235_v46 = vmul.f32 1.442695, %v1228_v49  ;;  %v4854_v57 = vmul.f32 %v3842_v51, %v4804_v0  ;;  %v4907_v49 = vsel %vm1358_vm8, %v4527_v16, 0 }
 0x265   : > { %v1313_v31 = vmul.f32 1.442695, %v1310_v52  ;;  %v1200_v13 = vsel %vm1058_vm5, %v4851_v54, 0.0  ;;  %v1133_v59 = vsel %vm1058_vm5, %v4849_v53, 0.0  ;;  %3522 = vmatpush3.bf16.msra.mxu1 %v4907_v49 }
 0x266   : > { %3857 = vpow2.f32 %v1233_v25  ;;  %1201 = vadd.xlane.f32.xlu1 %v1200_v13  ;;  %1288 = vadd.xlane.f32.xlu0 %v1287_v47  ;;  %v1134_v58 = vsel %vm1058_vm5, %v4854_v57, 0.0 }
 0x267   : > { %3859 = vpow2.f32 %v1235_v46  ;;  %v1135_v2 = vadd.f32 %v1134_v58, %v1133_v59  ;;  %3533 = vmatprep.subr.bf16.mxu1 %v4186_v1 }
 0x268   : > { %v4864_v55 = vpop.eup %3845  ;;  %3861 = vpow2.f32 %v1313_v31 }
 0x269   : > { %v3848_v56 = vpop.eup %3847  ;;  %v1290_v60 = vsel %vm1058_vm5, %v4864_v55, 0.0  ;;  %v1136_v62 = vrot.slane %v1135_v2, 4 }
 0x26a   : > { %v3850_v63 = vpop.eup %3849  ;;  %1291 = vadd.xlane.f32.xlu1 %v1290_v60  ;;  %v4869_v3 = vmul.f32 %v3848_v56, %v4814_v61 }
 0x26b   : > { %v1137_v7 = vadd.f32 %v1136_v62, %v1135_v2  ;;  %v4872_v9 = vmul.f32 %v3850_v63, %v4826_v23 }
 0x26c   : > { %v3852_v10 = vpop.eup %3851  ;;  %v1142_v11 = vsel %vm1058_vm5, %v4869_v3, 0.0 }
 0x26d   : > { %v3854_v12 = vpop.eup %3853  ;;  %v1138_v15 = vrot.slane %v1137_v7, 2  ;;  %v1143_v18 = vsel %vm1058_vm5, %v4872_v9, 0.0  ;;  %v4879_v19 = vmul.f32 %v3852_v10, %v4839_v42 }
 0x26e   : > { %v3856_v17 = vpop.eup %3855  ;;  %v1144_v20 = vadd.f32 %v1143_v18, %v1142_v11  ;;  %v4882_v29 = vmul.f32 %v3854_v12, %v4819_v4 }
 0x26f   : > { %v1139_v5 = vadd.f32 %v1138_v15, %v1137_v7  ;;  %v4889_v6 = vmul.f32 %v3856_v17, %v4837_v41  ;;  %v1317_v26 = vsel %vm1058_vm5, %v4879_v19, 0.0 }
 0x270   : > { %v1145_v27 = vrot.slane %v1144_v20, 4  ;;  %v1241_v32 = vsel %vm1058_vm5, %v4882_v29, 0.0  ;;  %v1318_v33 = vrot.slane %v1317_v26, 4 }
 0x271   : > { %v1140_v38 = vrot.slane %v1139_v5, 1  ;;  %v1242_v14 = vsel %vm1058_vm5, %v4889_v6, 0.0 }
 0x272   : > { %v1146_v24 = vadd.f32 %v1145_v27, %v1144_v20  ;;  %v1243_v39 = vadd.f32 %v1242_v14, %v1241_v32  ;;  %v1319_v37 = vadd.f32 %v1318_v33, %v1317_v26 }
 0x273   : > { %v3858_v21 = vpop.eup %3857  ;;  %v1141_v28 = vadd.f32 %v1140_v38, %v1139_v5 }
 0x274   : > { %v3860_v40 = vpop.eup %3859  ;;  %v1147_v8 = vrot.slane %v1146_v24, 2  ;;  %v1244_v30 = vrot.slane %v1243_v39, 4  ;;  %v4900_v43 = vmul.f32 %v3858_v21, %v4833_v35  ;;  %v1320_v44 = vrot.slane %v1319_v37, 2 }
 0x275   : > { %v3862_v45 = vpop.eup %3861  ;;  %v4903_v48 = vmul.f32 %v3860_v40, %v4851_v54  ;;  %3863 = vrcp.f32 %v1141_v28  ;;  %vm1151_vm9 = vcmp.gt.f32.partialorder %v1141_v28, 0.0 }
 0x276   : > { %v1148_v51 = vadd.f32 %v1147_v8, %v1146_v24  ;;  %v1245_v52 = vadd.f32 %v1244_v30, %v1243_v39  ;;  %v1250_v25 = vsel %vm1058_vm5, %v4900_v43, 0.0  ;;  %v1321_v46 = vadd.f32 %v1320_v44, %v1319_v37 }
 0x277   : > { %v1251_v31 = vsel %vm1058_vm5, %v4903_v48, 0.0  ;;  %v4915_v13 = vmul.f32 %v3862_v45, %v4864_v55 }
 0x278   : > { %v1149_v47 = vrot.slane %v1148_v51, 1  ;;  %v1246_v59 = vrot.slane %v1245_v52, 2  ;;  %v1252_v16 = vadd.f32 %v1251_v31, %v1250_v25  ;;  %v1322_v58 = vrot.slane %v1321_v46, 1 }
 0x279   : > { %v1324_v2 = vsel %vm1058_vm5, %v4915_v13, 0.0 }
 0x27a   : > { %v1150_v56 = vadd.f32 %v1149_v47, %v1148_v51  ;;  %v1247_v60 = vadd.f32 %v1246_v59, %v1245_v52  ;;  %v1253_v62 = vrot.slane %v1252_v16, 4  ;;  %v1325_v63 = vrot.slane %v1324_v2, 4 }
 0x27b   : > { %v1323_v11 = vadd.f32 %v1322_v58, %v1321_v46 }
 0x27c   : > { %v1248_v7 = vrot.slane %v1247_v60, 1  ;;  %v1254_v10 = vadd.f32 %v1253_v62, %v1252_v16  ;;  %v1326_v12 = vadd.f32 %v1325_v63, %v1324_v2  ;;  %3865 = vrcp.f32 %v1150_v56 }
 0x27d   : > { %vm1152_vm10 = vcmp.gt.f32.partialorder %v1150_v56, 0.0  ;;  %vm1331_vm13 = vcmp.gt.f32.partialorder %v1323_v11, 0.0 }
 0x27e   : > { %v1249_v15 = vadd.f32 %v1248_v7, %v1247_v60  ;;  %v1255_v18 = vrot.slane %v1254_v10, 2  ;;  %v1327_v17 = vrot.slane %v1326_v12, 2 }
 0x280   : > { %3867 = vrcp.f32 %v1249_v15  ;;  %v1256_v20 = vadd.f32 %v1255_v18, %v1254_v10  ;;  %v1328_v5 = vadd.f32 %v1327_v17, %v1326_v12  ;;  %vm1259_vm11 = vcmp.gt.f32.partialorder %v1249_v15, 0.0 }
 0x281   : > { %3869 = vrcp.f32 %v1323_v11 }
 0x282   : > { %v1257_v26 = vrot.slane %v1256_v20, 1  ;;  %v1329_v27 = vrot.slane %v1328_v5, 1  ;;  %v3864_v38 = vpop.eup %3863 }
 0x283   : > { %v1155_v14 = vmul.f32 %v3864_v38, %v4849_v53  ;;  %v1156_v24 = vmul.f32 %v3864_v38, %v4854_v57 }
 0x284   : > { %v1258_v32 = vadd.f32 %v1257_v26, %v1256_v20  ;;  %v1330_v33 = vadd.f32 %v1329_v27, %v1328_v5  ;;  %v4933_v20 = vld [vmem:[%s4533_s22] sm:$0xff]  ;;  %v4936_v5 = vld [vmem:[%s4533_s22 + $0x48] sm:$0xff] }
 0x285   : > { %v1163_v21 = vsel %vm1151_vm9, %v1155_v14, 0.0625  ;;  %v1164_v40 = vsel %vm1151_vm9, %v1156_v24, 0.0625  ;;  %v412_v26 = vpack.c.bf16 %v4936_v5, %v4933_v20  ;;  %v4950_v24 = vld [vmem:[%s4533_s22 + $0x90] sm:$0xff] }
 0x286   : > { %3871 = vrcp.f32 %v1258_v32  ;;  %v1345_v52 = vpack.c.bf16 %v1164_v40, %v1163_v21  ;;  %vm1260_vm12 = vcmp.gt.f32.partialorder %v1258_v32, 0.0  ;;  %vm1332_vm14 = vcmp.gt.f32.partialorder %v1330_v33, 0.0 }
 0x287   : > { %3873 = vrcp.f32 %v1330_v33 }
 0x289   : > { %v3866_v39 = vpop.eup %3865 }
 0x28a   : > { %v1157_v30 = vmul.f32 %v3866_v39, %v4869_v3  ;;  %v1158_v44 = vmul.f32 %v3866_v39, %v4872_v9  ;;  %v4953_v39 = vld [vmem:[%s4533_s22 + $0xd8] sm:$0xff] }
 0x28c   : > { %v1165_v57 = vsel %vm1152_vm10, %v1157_v30, 0.0625  ;;  %v1166_v25 = vsel %vm1152_vm10, %v1158_v44, 0.0625 }
 0x28d   : > { %v3868_v37 = vpop.eup %3867  ;;  %v1346_v59 = vpack.c.bf16 %v1166_v25, %v1165_v57 }
 0x28e   : > { %v3870_v8 = vpop.eup %3869  ;;  %v1263_v45 = vmul.f32 %v3868_v37, %v4882_v29  ;;  %v1264_v51 = vmul.f32 %v3868_v37, %v4889_v6  ;;  %v413_v37 = vpack.c.bf16 %v4953_v39, %v4950_v24 }
 0x28f   : > { %v1335_v53 = vmul.f32 %v3870_v8, %v4879_v19  ;;  %v1573_v8 = vsel %vm1358_vm8, %v4565_v34, 0 }
 0x290   : > { %v1271_v28 = vsel %vm1259_vm11, %v1263_v45, 0.0625  ;;  %v1272_v46 = vsel %vm1259_vm11, %v1264_v51, 0.0625  ;;  %v1620_v51 = vsel %vm1358_vm8, %v4567_v36, 0 }
 0x291   : > { %v1349_v29 = vpack.c.bf16 %v1272_v46, %v1271_v28  ;;  %v1341_v58 = vsel %vm1331_vm13, %v1335_v53, 0.125 }
 0x292   : > { %v1353_v56 = vpack.c.bf16 %v1341_v58, %v1341_v58 }
 0x293   : > { %v3872_v31 = vpop.eup %3871  ;;  %1450 = vxpose.xlu0.c.b16.start.end [1/1] (short) (narrow) %v1345_v52, 16 }
 0x294   : > { %v3874_v47 = vpop.eup %3873  ;;  %v1265_v3 = vmul.f32 %v3872_v31, %v4900_v43  ;;  %v1266_v9 = vmul.f32 %v3872_v31, %v4903_v48 }
 0x295   : > { %v1336_v19 = vmul.f32 %v3874_v47, %v4915_v13 }
 0x296   : > { %v1273_v6 = vsel %vm1260_vm12, %v1265_v3, 0.0625  ;;  %v1274_v16 = vsel %vm1260_vm12, %v1266_v9, 0.0625 }
 0x297   : > { %1510 = vxpose.xlu1.c.b16.start.end [1/1] (short) (narrow) %v1346_v59, 16  ;;  %1663 = vxpose.xlu0.c.b16.start.end [1/1] (short) (narrow) %v1349_v29, 16  ;;  %v1350_v2 = vpack.c.bf16 %v1274_v16, %v1273_v6  ;;  %v1342_v60 = vsel %vm1332_vm14, %v1336_v19, 0.125 }
 0x298   : > { %v1354_v43 = vpack.c.bf16 %v1342_v60, %v1342_v60 }
 0x29b   : > { %1722 = vxpose.xlu1.c.b16.start.end [1/1] (short) (narrow) %v1350_v2, 16  ;;  %1867 = vxpose.xlu0.c.b16.start.end [1/1] (short) (narrow) %v1353_v56, 16  ;;  %v5065_v56 = vld [vmem:[%s4505_s17] sm:$0xff] }
 0x29f   : > { %1926 = vxpose.xlu1.c.b16.start.end [1/1] (short) (narrow) %v1354_v43, 16 }
 0x2df   : > { %v1088_v48 = vpop.xlane.xlu1 %1087  ;;  %v1085_v62 = vpop.xlane.xlu0 %1084 }
 0x2e0   : > { %3875 = vrcp.f32 %v1088_v48 }
 0x2e1   : > { %3877 = vrcp.f32 %v1085_v62 }
 0x2e3   : > { %v1091_v63 = vpop.xlane.xlu0 %1090 }
 0x2e4   : > { %3879 = vrcp.f32 %v1091_v63 }
 0x2e7   : > { %v1094_v7 = vpop.xlane.xlu1 %1093  ;;  %v1193_v13 = vpop.xlane.xlu0 %1192 }
 0x2e8   : > { %3881 = vrcp.f32 %v1094_v7 }
 0x2eb   : > { %v1196_v10 = vpop.xlane.xlu1 %1195  ;;  %v1199_v15 = vpop.xlane.xlu0 %1198 }
 0x2ec   : > { %3883 = vrcp.f32 %v1196_v10 }
 0x2ed   : > { %v3876_v11 = vpop.eup %3875  ;;  %3885 = vrcp.f32 %v1193_v13 }
 0x2ee   : > { %v3878_v12 = vpop.eup %3877  ;;  %v1100_v18 = vmul.f32 %v3876_v11, %v4804_v0 }
 0x2ef   : > { %v1099_v17 = vmul.f32 %v3878_v12, %v4802_v50  ;;  %v1202_v27 = vpop.xlane.xlu1 %1201  ;;  %v1289_v0 = vpop.xlane.xlu0 %1288 }
 0x2f0   : > { %3887 = vrcp.f32 %v1202_v27 }
 0x2f1   : > { %v4940_v32 = vpack.c.bf16 %v1100_v18, %v1099_v17  ;;  %v3880_v33 = vpop.eup %3879  ;;  %3889 = vrcp.f32 %v1199_v15  ;;  %v5086_v18 = vld [vmem:[%s4505_s17 + $0x48] sm:$0xff] }
 0x2f2   : > { %v1101_v38 = vmul.f32 %v3880_v33, %v4814_v61  ;;  %3891 = vrcp.f32 %v1289_v0 }
 0x2f3   : > { %3518 = vmatmul.mubr.msk.bf16.vlgmr.msra.gmra.mxu0 %vm1058_vm5, %v4940_v32  ;;  %v1292_v61 = vpop.xlane.xlu1 %1291 }
 0x2f4   : > { %3528 = vmatpush3.bf16.msra.mxu0 %v412_v26  ;;  %3529 = vmatprep.mubr.msk.bf16.mxu0 %vm4187_vm0, %v4186_v1  ;;  %3893 = vrcp.f32 %v1292_v61 }
 0x2f5   : > { %v3882_v50 = vpop.eup %3881  ;;  %3539 = vmatprep.subr.bf16.mxu0 %v4186_v1  ;;  %v4957_v21 = vpop.trf.xlu0 }
 0x2f6   : > { %v1102_v14 = vmul.f32 %v3882_v50, %v4826_v23 }
 0x2f8   : > { %v4959_v40 = vpack.c.bf16 %v1102_v14, %v1101_v38 }
 0x2f9   : > { %v3884_v30 = vpop.eup %3883  ;;  %v4974_v44 = vpop.trf.xlu1 }
 0x2fa   : > { %3524 = vmatmul.mubr.msk.bf16.vlgmr.msra.gmra.mxu1 %vm1058_vm5, %v4959_v40  ;;  %v3886_v23 = vpop.eup %3885  ;;  %v1208_v34 = vmul.f32 %v3884_v30, %v4837_v41  ;;  %v4993_v41 = vpop.trf.xlu0 }
 0x2fb   : > { %3530 = vmatmul.mubr.msk.bf16.vlgmr.msra.gmra.mxu0 %vm1466_vm15, %v4957_v21  ;;  %3534 = vmatpush3.bf16.msra.mxu1 %v413_v37  ;;  %v1207_v45 = vmul.f32 %v3886_v23, %v4819_v4  ;;  %v3901_v23 = vld [vmem:[%s4510_s2] sm:$0xff] }
 0x2fc   : > { %3540 = vmatpush3.bf16.msra.mxu0 %v1573_v8  ;;  %3535 = vmatprep.mubr.msk.bf16.mxu1 %vm4187_vm0, %v4186_v1 }
 0x2fd   : > { %3541 = vmatprep.mubr.msk.bf16.mxu0 %vm4187_vm0, %v4186_v1  ;;  %3545 = vmatprep.subr.bf16.mxu1 %v4186_v1  ;;  %v3888_v52 = vpop.eup %3887  ;;  %v4979_v53 = vpack.c.bf16 %v1208_v34, %v1207_v45 }
 0x2fe   : > { %3551 = vmatprep.subr.bf16.mxu0 %v4186_v1  ;;  %v3890_v57 = vpop.eup %3889  ;;  %v1210_v4 = vmul.f32 %v3888_v52, %v4851_v54  ;;  %v5008_v54 = vpop.trf.xlu1 }
 0x2ff   : > { %v1209_v36 = vmul.f32 %v3890_v57, %v4833_v35  ;;  %v3892_v28 = vpop.eup %3891  ;;  %v5026_v3 = vpop.trf.xlu0 }
 0x300   : > { %v1295_v35 = vmul.f32 %v3892_v28, %v4839_v42 }
 0x301   : > { %v4995_v25 = vpack.c.bf16 %v1210_v4, %v1209_v36  ;;  %v3894_v46 = vpop.eup %3893 }
 0x302   : > { %3536 = vmatmul.mubr.msk.bf16.vlgmr.msra.gmra.mxu1 %vm1466_vm15, %v4974_v44  ;;  %v5010_v31 = vpack.c.bf16 %v1295_v35, %v1295_v35  ;;  %v1296_v42 = vmul.f32 %v3894_v46, %v4864_v55  ;;  %v5038_v55 = vpop.trf.xlu1  ;;  %v3902_v35 = vld [vmem:[%s4510_s2 + $0x48] sm:$0xff] }
 0x303   : > { %3542 = vmatmul.mubr.msk.bf16.vlgmr.msra.gmra.mxu0 %vm1058_vm5, %v4979_v53  ;;  %3546 = vmatpush3.bf16.msra.mxu1 %v1620_v51 }
 0x304   : > { %3552 = vmatpush3.bf16.msra.mxu0 %v412_v26  ;;  %3547 = vmatprep.mubr.msk.bf16.mxu1 %vm4187_vm0, %v4186_v1  ;;  %v5024_v47 = vpack.c.bf16 %v1296_v42, %v1296_v42 }
 0x305   : > { %3553 = vmatprep.mubr.msk.bf16.mxu0 %vm4187_vm0, %v4186_v1  ;;  %3557 = vmatprep.subr.bf16.mxu1 %v4186_v1 }
 0x306   : > { %3563 = vmatprep.subr.bf16.mxu0 %v4186_v1 }
 0x30a   : > { %3548 = vmatmul.mubr.msk.bf16.vlgmr.msra.gmra.mxu1 %vm1058_vm5, %v4995_v25 }
 0x30b   : > { %3554 = vmatmul.mubr.msk.bf16.vlgmr.msra.gmra.mxu0 %vm1466_vm15, %v4993_v41  ;;  %3558 = vmatpush3.bf16.msra.mxu1 %v413_v37 }
 0x30c   : > { %3564 = vmatpush3.bf16.msra.mxu0 %v1573_v8  ;;  %3559 = vmatprep.mubr.msk.bf16.mxu1 %vm4187_vm0, %v4186_v1 }
 0x30d   : > { %3565 = vmatprep.mubr.msk.bf16.mxu0 %vm4187_vm0, %v4186_v1  ;;  %3569 = vmatprep.subr.bf16.mxu1 %v4186_v1 }
 0x30e   : > { %3575 = vmatprep.subr.bf16.mxu0 %v4186_v1 }
 0x312   : > { %3560 = vmatmul.mubr.msk.bf16.vlgmr.msra.gmra.mxu1 %vm1466_vm15, %v5008_v54 }
 0x313   : > { %3566 = vmatmul.mubr.msk.bf16.vlgmr.msra.gmra.mxu0 %vm1058_vm5, %v5010_v31  ;;  %3570 = vmatpush3.bf16.msra.mxu1 %v1620_v51 }
 0x314   : > { %3571 = vmatprep.mubr.msk.bf16.mxu1 %vm4187_vm0, %v4186_v1  ;;  %3576 = vmatpush3.bf16.msra.mxu0 %v4886_v22 }
 0x315   : > { %3581 = vmatprep.subr.bf16.mxu1 %v4186_v1  ;;  %3577 = vmatprep.mubr.msk.bf16.mxu0 %vm4187_vm0, %v4186_v1 }
 0x316   : > { %3587 = vmatprep.subr.bf16.mxu0 %v4186_v1 }
 0x31a   : > { %3572 = vmatmul.mubr.msk.bf16.vlgmr.msra.gmra.mxu1 %vm1058_vm5, %v5024_v47 }
 0x31b   : > { %3578 = vmatmul.mubr.msk.bf16.vlgmr.msra.gmra.mxu0 %vm1058_vm5, %v5026_v3  ;;  %3582 = vmatpush3.bf16.msra.mxu1 %v4907_v49 }
 0x31c   : > { %3583 = vmatprep.mubr.msk.bf16.mxu1 %vm4187_vm0, %v4186_v1  ;;  %3589 = vmatprep.mubr.msk.bf16.mxu0 %vm4187_vm0, %v4186_v1 }
 0x31d   : > { %3593 = vmatprep.subr.bf16.mxu1 %v4186_v1 }
 0x322   : > { %3584 = vmatmul.mubr.msk.bf16.vlgmr.msra.gmra.mxu1 %vm1058_vm5, %v5038_v55 }
 0x323   : > { %3595 = vmatprep.mubr.msk.bf16.mxu1 %vm4187_vm0, %v4186_v1 }
 0x3b3   : > { %v5044_v22 = vpop.f32.mrf.mxu0 }
 0x3b4   : > { %v1997_v49 = vmul.f32 %v4933_v20, %v5044_v22  ;;  %2361 = vst [vmem:[%s4533_s22 + $0x8] sm:$0xff] %v5044_v22 }
 0x3b5   : > { %v3519_v9 = vpop.f32.mrf.mxu0 }
 0x3b6   : > { %2369 = vst [vmem:[%s4533_s22 + $0x18] sm:$0xff] %v1997_v49 }
 0x3b7   : > { %v5051_v59 = vpop.f32.mrf.mxu0 }
 0x3b8   : > { %v1998_v29 = vmul.f32 %v4936_v5, %v5051_v59  ;;  %2362 = vst [vmem:[%s4533_s22 + $0x50] sm:$0xff] %v5051_v59 }
 0x3b9   : > { %v3520_v6 = vpop.f32.mrf.mxu0 }
 0x3ba   : > { %2370 = vst [vmem:[%s4533_s22 + $0x60] sm:$0xff] %v1998_v29  ;;  %v5058_v16 = vpop.f32.mrf.mxu1 }
 0x3bb   : > { %v1999_v58 = vmul.f32 %v4950_v24, %v5058_v16  ;;  %2363 = vst [vmem:[%s4533_s22 + $0x98] sm:$0xff] %v5058_v16  ;;  %v1504_v19 = vpop.f32.mrf.mxu0 }
 0x3bc   : > { %v1987_v2 = vpack.c.bf16 %v1504_v19, %v1504_v19  ;;  %v2393_v60 = vmul.f32 %v5065_v56, %v1504_v19  ;;  %2719 = vst [vmem:[%s4505_s17 + $0x8] sm:$0xff] %v1504_v19  ;;  %v3525_v43 = vpop.f32.mrf.mxu1 }
 0x3bd   : > { %2371 = vst [vmem:[%s4533_s22 + $0xa8] sm:$0xff] %v1999_v58  ;;  %v3531_v48 = vpop.f32.mrf.mxu0 }
 0x3be   : > { %2723 = vst [vmem:[%s4505_s17 + $0x18] sm:$0xff] %v2393_v60  ;;  %v5071_v62 = vpop.f32.mrf.mxu1  ;;  %v5074_v63 = vsel %vm1358_vm8, %v1987_v2, 0 }
 0x3bf   : > { %v2000_v7 = vmul.f32 %v4953_v39, %v5071_v62  ;;  %2364 = vst [vmem:[%s4533_s22 + $0xe0] sm:$0xff] %v5071_v62  ;;  %v1507_v13 = vpop.f32.mrf.mxu0  ;;  %3588 = vmatpush3.bf16.msra.mxu0 %v5074_v63 }
 0x3c0   : > { %v3526_v10 = vpop.f32.mrf.mxu1  ;;  %3599 = vmatprep.subr.bf16.mxu0 %v4186_v1 }
 0x3c1   : > { %2372 = vst [vmem:[%s4533_s22 + $0xf0] sm:$0xff] %v2000_v7  ;;  %v3532_v11 = vpop.f32.mrf.mxu0 }
 0x3c2   : > { %3590 = vmatmul.mubr.msk.bf16.vlgmr.msra.gmra.mxu0 %vm1058_vm5, %v4940_v32  ;;  %v1563_v12 = vpop.f32.mrf.mxu1 }
 0x3c3   : > { %v1988_v15 = vpack.c.bf16 %v1563_v12, %v1563_v12  ;;  %v2394_v17 = vmul.f32 %v5086_v18, %v1563_v12  ;;  %2720 = vst [vmem:[%s4505_s17 + $0x50] sm:$0xff] %v1563_v12  ;;  %v5090_v26 = vpop.f32.mrf.mxu0  ;;  %3601 = vmatprep.mubr.msk.bf16.mxu0 %vm4187_vm0, %v4186_v1 }
 0x3c4   : > { %v2001_v27 = vmul.f32 %v4933_v20, %v5090_v26  ;;  %2365 = vst [vmem:[%s4533_s22 + $0x10] sm:$0xff] %v5090_v26  ;;  %v3537_v33 = vpop.f32.mrf.mxu1 }
 0x3c5   : > { %2724 = vst [vmem:[%s4505_s17 + $0x60] sm:$0xff] %v2394_v17  ;;  %v3543_v0 = vpop.f32.mrf.mxu0  ;;  %v5100_v50 = vsel %vm1358_vm8, %v1988_v15, 0 }
 0x3c6   : > { %2373 = vst [vmem:[%s4533_s22 + $0x20] sm:$0xff] %v2001_v27  ;;  %v1566_v38 = vpop.f32.mrf.mxu1  ;;  %3594 = vmatpush3.bf16.msra.mxu1 %v5100_v50 }
 0x3c7   : > { %v5104_v14 = vpop.f32.mrf.mxu0  ;;  %3605 = vmatprep.subr.bf16.mxu1 %v4186_v1 }
 0x3c8   : > { %v2002_v20 = vmul.f32 %v4936_v5, %v5104_v14  ;;  %2366 = vst [vmem:[%s4533_s22 + $0x58] sm:$0xff] %v5104_v14  ;;  %v3538_v37 = vpop.f32.mrf.mxu1 }
 0x3c9   : > { %v3544_v8 = vpop.f32.mrf.mxu0  ;;  %3596 = vmatmul.mubr.msk.bf16.vlgmr.msra.gmra.mxu1 %vm1058_vm5, %v4959_v40 }
 0x3ca   : > { %2374 = vst [vmem:[%s4533_s22 + $0x68] sm:$0xff] %v2002_v20  ;;  %v5114_v30 = vpop.f32.mrf.mxu1  ;;  %3607 = vmatprep.mubr.msk.bf16.mxu1 %vm4187_vm0, %v4186_v1 }
 0x3cb   : > { %v2003_v61 = vmul.f32 %v4950_v24, %v5114_v30  ;;  %2367 = vst [vmem:[%s4533_s22 + $0xa0] sm:$0xff] %v5114_v30  ;;  %v1716_v5 = vpop.f32.mrf.mxu0 }
 0x3cc   : > { %v2735_v34 = vmul.f32 %v3901_v23, %v1716_v5  ;;  %3061 = vst [vmem:[%s4510_s2 + $0x8] sm:$0xff] %v1716_v5  ;;  %v3549_v45 = vpop.f32.mrf.mxu1  ;;  %v1991_v6 = vpack.c.bf16 %v1716_v5, %v1716_v5 }
 0x3cd   : > { %2375 = vst [vmem:[%s4533_s22 + $0xb0] sm:$0xff] %v2003_v61  ;;  %v3555_v51 = vpop.f32.mrf.mxu0 }
 0x3ce   : > { %3065 = vst [vmem:[%s4510_s2 + $0x18] sm:$0xff] %v2735_v34  ;;  %v5126_v52 = vpop.f32.mrf.mxu1  ;;  %v5147_v48 = vsel %vm1358_vm8, %v1991_v6, 0  ;;  %v1985_v51 = vpack.c.bf16 %v5051_v59, %v5044_v22  ;;  %v1986_v22 = vpack.c.bf16 %v5071_v62, %v5058_v16  ;;  %v1989_v59 = vpack.c.bf16 %v5104_v14, %v5090_v26 }
 0x3cf   : > { %v2004_v57 = vmul.f32 %v4953_v39, %v5126_v52  ;;  %2368 = vst [vmem:[%s4533_s22 + $0xe8] sm:$0xff] %v5126_v52  ;;  %v1719_v24 = vpop.f32.mrf.mxu0 }
 0x3d0   : > { %v3550_v4 = vpop.f32.mrf.mxu1 }
 0x3d1   : > { %2376 = vst [vmem:[%s4533_s22 + $0xf8] sm:$0xff] %v2004_v57  ;;  %v3556_v36 = vpop.f32.mrf.mxu0 }
 0x3d2   : > { %v1775_v28 = vpop.f32.mrf.mxu1 }
 0x3d3   : > { %v2736_v46 = vmul.f32 %v3902_v35, %v1775_v28  ;;  %3062 = vst [vmem:[%s4510_s2 + $0x50] sm:$0xff] %v1775_v28  ;;  %v1818_v42 = vpop.f32.mrf.mxu0 }
 0x3d4   : > { %v1993_v49 = vpack.c.bf16 %v1818_v42, %v1818_v42  ;;  %v2395_v9 = vmul.f32 %v5065_v56, %v1818_v42  ;;  %2721 = vst [vmem:[%s4505_s17 + $0x10] sm:$0xff] %v1818_v42  ;;  %v3561_v29 = vpop.f32.mrf.mxu1 }
 0x3d5   : > { %3066 = vst [vmem:[%s4510_s2 + $0x60] sm:$0xff] %v2736_v46  ;;  %v3567_v39 = vpop.f32.mrf.mxu0 }
 0x3d6   : > { %2725 = vst [vmem:[%s4505_s17 + $0x20] sm:$0xff] %v2395_v9  ;;  %v1778_v58 = vpop.f32.mrf.mxu1  ;;  %v5140_v19 = vsel %vm1358_vm8, %v1993_v49, 0 }
 0x3d7   : > { %v1821_v2 = vpop.f32.mrf.mxu0  ;;  %3600 = vmatpush3.bf16.msra.mxu0 %v5140_v19 }
 0x3d8   : > { %v3562_v60 = vpop.f32.mrf.mxu1  ;;  %3611 = vmatprep.subr.bf16.mxu0 %v4186_v1 }
 0x3d9   : > { %v3568_v43 = vpop.f32.mrf.mxu0 }
 0x3da   : > { %3602 = vmatmul.mubr.msk.bf16.vlgmr.msra.gmra.mxu0 %vm1058_vm5, %v4940_v32  ;;  %v1861_v56 = vpop.f32.mrf.mxu1  ;;  %v1992_v32 = vpack.c.bf16 %v1775_v28, %v1775_v28 }
 0x3db   : > { %v1994_v7 = vpack.c.bf16 %v1861_v56, %v1861_v56  ;;  %v2396_v13 = vmul.f32 %v5086_v18, %v1861_v56  ;;  %2722 = vst [vmem:[%s4505_s17 + $0x58] sm:$0xff] %v1861_v56  ;;  %3612 = vmatpush3.bf16.msra.mxu0 %v5147_v48  ;;  %3613 = vmatprep.mubr.msk.bf16.mxu0 %vm4187_vm0, %v4186_v1  ;;  %v1920_v10 = vpop.f32.mrf.mxu0 }
 0x3dc   : > { %v3573_v11 = vpop.f32.mrf.mxu1  ;;  %v1995_v12 = vpack.c.bf16 %v1920_v10, %v1920_v10  ;;  %v2737_v15 = vmul.f32 %v3901_v23, %v1920_v10  ;;  %3063 = vst [vmem:[%s4510_s2 + $0x10] sm:$0xff] %v1920_v10  ;;  %3623 = vmatprep.subr.bf16.mxu0 %v4186_v1  ;;  %v2226_v20 = vsel %vm1358_vm8, %v1992_v32, 0 }
 0x3dd   : > { %2726 = vst [vmem:[%s4505_s17 + $0x68] sm:$0xff] %v2396_v13  ;;  %v5158_v17 = vsel %vm1358_vm8, %v1994_v7, 0  ;;  %v3579_v18 = vpop.f32.mrf.mxu0 }
 0x3de   : > { %v1864_v27 = vpop.f32.mrf.mxu1  ;;  %3606 = vmatpush3.bf16.msra.mxu1 %v5158_v17  ;;  %3067 = vst [vmem:[%s4510_s2 + $0x20] sm:$0xff] %v2737_v15  ;;  %v2270_v38 = vsel %vm1358_vm8, %v1995_v12, 0 }
 0x3df   : > { %3617 = vmatprep.subr.bf16.mxu1 %v4186_v1  ;;  %v1923_v33 = vpop.f32.mrf.mxu0 }
 0x3e0   : > { %v3574_v0 = vpop.f32.mrf.mxu1 }
 0x3e1   : > { %3608 = vmatmul.mubr.msk.bf16.vlgmr.msra.gmra.mxu1 %vm1058_vm5, %v4959_v40  ;;  %v3580_v37 = vpop.f32.mrf.mxu0 }
 0x3e2   : > { %3614 = vmatmul.mubr.msk.bf16.vlgmr.msra.gmra.mxu0 %vm1058_vm5, %v4979_v53  ;;  %3618 = vmatpush3.bf16.msra.mxu1 %v2226_v20  ;;  %v1979_v8 = vpop.f32.mrf.mxu1 }
 0x3e3   : > { %v1996_v61 = vpack.c.bf16 %v1979_v8, %v1979_v8  ;;  %v2738_v5 = vmul.f32 %v3902_v35, %v1979_v8  ;;  %3064 = vst [vmem:[%s4510_s2 + $0x58] sm:$0xff] %v1979_v8  ;;  %3624 = vmatpush3.bf16.msra.mxu0 %v2270_v38  ;;  %3619 = vmatprep.mubr.msk.bf16.mxu1 %vm4187_vm0, %v4186_v1 }
 0x3e4   : > { %v3585_v23 = vpop.f32.mrf.mxu1  ;;  %3625 = vmatprep.mubr.msk.bf16.mxu0 %vm4187_vm0, %v4186_v1  ;;  %3635 = vmatprep.subr.bf16.mxu0 %v4186_v1 }
 0x3e5   : > { %3068 = vst [vmem:[%s4510_s2 + $0x68] sm:$0xff] %v2738_v5  ;;  %3629 = vmatprep.subr.bf16.mxu1 %v4186_v1  ;;  %v2314_v34 = vsel %vm1358_vm8, %v1996_v61, 0 }
 0x3e6   : > { %v1982_v40 = vpop.f32.mrf.mxu1 }
 0x3e8   : > { %v3586_v45 = vpop.f32.mrf.mxu1 }
 0x3e9   : > { %3620 = vmatmul.mubr.msk.bf16.vlgmr.msra.gmra.mxu1 %vm1058_vm5, %v4995_v25 }
 0x3ea   : > { %3626 = vmatmul.mubr.msk.bf16.vlgmr.msra.gmra.mxu0 %vm1058_vm5, %v4979_v53  ;;  %3630 = vmatpush3.bf16.msra.mxu1 %v2314_v34  ;;  %v1990_v53 = vpack.c.bf16 %v5126_v52, %v5114_v30 }
 0x3eb   : > { %3636 = vmatpush3.bf16.msra.mxu0 %v1985_v51  ;;  %3631 = vmatprep.mubr.msk.bf16.mxu1 %vm4187_vm0, %v4186_v1 }
 0x3ec   : > { %3637 = vmatprep.mubr.msk.bf16.mxu0 %vm4187_vm0, %v4186_v1  ;;  %3641 = vmatprep.subr.bf16.mxu1 %v4186_v1 }
 0x3ed   : > { %3647 = vmatprep.subr.bf16.mxu0 %v4186_v1 }
 0x3f1   : > { %3632 = vmatmul.mubr.msk.bf16.vlgmr.msra.gmra.mxu1 %vm1058_vm5, %v4995_v25 }
 0x3f2   : > { %3638 = vmatmul.mubr.msk.bf16.vlgmr.msra.gmra.mxu0 %vm1466_vm15, %v4957_v21  ;;  %3642 = vmatpush3.bf16.msra.mxu1 %v1986_v22 }
 0x3f3   : > { %3648 = vmatpush3.bf16.msra.mxu0 %v1989_v59  ;;  %3643 = vmatprep.mubr.msk.bf16.mxu1 %vm4187_vm0, %v4186_v1 }
 0x3f4   : > { %3649 = vmatprep.mubr.msk.bf16.mxu0 %vm4187_vm0, %v4186_v1  ;;  %3653 = vmatprep.subr.bf16.mxu1 %v4186_v1 }
 0x3f5   : > { %3659 = vmatprep.subr.bf16.mxu0 %v4186_v1 }
 0x3f9   : > { %3644 = vmatmul.mubr.msk.bf16.vlgmr.msra.gmra.mxu1 %vm1466_vm15, %v4974_v44 }
 0x3fa   : > { %3650 = vmatmul.mubr.msk.bf16.vlgmr.msra.gmra.mxu0 %vm1466_vm15, %v4957_v21  ;;  %3654 = vmatpush3.bf16.msra.mxu1 %v1990_v53 }
 0x3fb   : > { %3660 = vmatpush3.bf16.msra.mxu0 %v5147_v48  ;;  %3655 = vmatprep.mubr.msk.bf16.mxu1 %vm4187_vm0, %v4186_v1 }
 0x3fc   : > { %3661 = vmatprep.mubr.msk.bf16.mxu0 %vm4187_vm0, %v4186_v1  ;;  %3665 = vmatprep.subr.bf16.mxu1 %v4186_v1 }
 0x3fd   : > { %3671 = vmatprep.subr.bf16.mxu0 %v4186_v1 }
 0x401   : > { %3656 = vmatmul.mubr.msk.bf16.vlgmr.msra.gmra.mxu1 %vm1466_vm15, %v4974_v44 }
 0x402   : > { %3662 = vmatmul.mubr.msk.bf16.vlgmr.msra.gmra.mxu0 %vm1058_vm5, %v5010_v31  ;;  %3666 = vmatpush3.bf16.msra.mxu1 %v2226_v20 }
 0x403   : > { %3672 = vmatpush3.bf16.msra.mxu0 %v2270_v38  ;;  %3667 = vmatprep.mubr.msk.bf16.mxu1 %vm4187_vm0, %v4186_v1 }
 0x404   : > { %3673 = vmatprep.mubr.msk.bf16.mxu0 %vm4187_vm0, %v4186_v1  ;;  %3677 = vmatprep.subr.bf16.mxu1 %v4186_v1 }
 0x405   : > { %3683 = vmatprep.subr.bf16.mxu0 %v4186_v1 }
 0x409   : > { %3668 = vmatmul.mubr.msk.bf16.vlgmr.msra.gmra.mxu1 %vm1058_vm5, %v5024_v47 }
 0x40a   : > { %3674 = vmatmul.mubr.msk.bf16.vlgmr.msra.gmra.mxu0 %vm1058_vm5, %v5010_v31  ;;  %3678 = vmatpush3.bf16.msra.mxu1 %v2314_v34 }
 0x40b   : > { %3684 = vmatpush3.bf16.msra.mxu0 %v1985_v51  ;;  %3679 = vmatprep.mubr.msk.bf16.mxu1 %vm4187_vm0, %v4186_v1 }
 0x40c   : > { %3685 = vmatprep.mubr.msk.bf16.mxu0 %vm4187_vm0, %v4186_v1  ;;  %3689 = vmatprep.subr.bf16.mxu1 %v4186_v1 }
 0x40d   : > { %3695 = vmatprep.subr.bf16.mxu0 %v4186_v1 }
 0x411   : > { %3680 = vmatmul.mubr.msk.bf16.vlgmr.msra.gmra.mxu1 %vm1058_vm5, %v5024_v47 }
 0x412   : > { %3686 = vmatmul.mubr.msk.bf16.vlgmr.msra.gmra.mxu0 %vm1466_vm15, %v4993_v41  ;;  %3690 = vmatpush3.bf16.msra.mxu1 %v1986_v22 }
 0x413   : > { %3696 = vmatpush3.bf16.msra.mxu0 %v1989_v59  ;;  %3691 = vmatprep.mubr.msk.bf16.mxu1 %vm4187_vm0, %v4186_v1 }
 0x414   : > { %3697 = vmatprep.mubr.msk.bf16.mxu0 %vm4187_vm0, %v4186_v1  ;;  %3701 = vmatprep.subr.bf16.mxu1 %v4186_v1 }
 0x415   : > { %3707 = vmatprep.subr.bf16.mxu0 %v4186_v1 }
 0x419   : > { %3692 = vmatmul.mubr.msk.bf16.vlgmr.msra.gmra.mxu1 %vm1466_vm15, %v5008_v54 }
 0x41a   : > { %3698 = vmatmul.mubr.msk.bf16.vlgmr.msra.gmra.mxu0 %vm1466_vm15, %v4993_v41  ;;  %3702 = vmatpush3.bf16.msra.mxu1 %v1990_v53 }
 0x41b   : > { %3708 = vmatpush3.bf16.msra.mxu0 %v5074_v63  ;;  %3703 = vmatprep.mubr.msk.bf16.mxu1 %vm4187_vm0, %v4186_v1 }
 0x41c   : > { %3709 = vmatprep.mubr.msk.bf16.mxu0 %vm4187_vm0, %v4186_v1  ;;  %3713 = vmatprep.subr.bf16.mxu1 %v4186_v1 }
 0x41d   : > { %3719 = vmatprep.subr.bf16.mxu0 %v4186_v1 }
 0x421   : > { %3704 = vmatmul.mubr.msk.bf16.vlgmr.msra.gmra.mxu1 %vm1466_vm15, %v5008_v54 }
 0x422   : > { %3710 = vmatmul.mubr.msk.bf16.vlgmr.msra.gmra.mxu0 %vm1058_vm5, %v5026_v3  ;;  %3714 = vmatpush3.bf16.msra.mxu1 %v5100_v50 }
 0x423   : > { %3720 = vmatpush3.bf16.msra.mxu0 %v5140_v19  ;;  %3715 = vmatprep.mubr.msk.bf16.mxu1 %vm4187_vm0, %v4186_v1 }
 0x424   : > { %3721 = vmatprep.mubr.msk.bf16.mxu0 %vm4187_vm0, %v4186_v1  ;;  %3725 = vmatprep.subr.bf16.mxu1 %v4186_v1 }
 0x429   : > { %3716 = vmatmul.mubr.msk.bf16.vlgmr.msra.gmra.mxu1 %vm1058_vm5, %v5038_v55 }
 0x42a   : > { %3722 = vmatmul.mubr.msk.bf16.vlgmr.msra.gmra.mxu0 %vm1058_vm5, %v5026_v3  ;;  %3726 = vmatpush3.bf16.msra.mxu1 %v5158_v17 }
 0x42b   : > { %3727 = vmatprep.mubr.msk.bf16.mxu1 %vm4187_vm0, %v4186_v1 }
 0x431   : > { %3728 = vmatmul.mubr.msk.bf16.vlgmr.msra.gmra.mxu1 %vm1058_vm5, %v5038_v55 }
 0x482   : > { %v2042_v21 = vpop.f32.mrf.mxu0 }
 0x483   : > { %2377 = vst [vmem:[%s4533_s22 + $0x28] sm:$0xff] %v2042_v21 }
 0x484   : > { %v3591_v44 = vpop.f32.mrf.mxu0 }
 0x486   : > { %v2045_v41 = vpop.f32.mrf.mxu0 }
 0x487   : > { %2378 = vst [vmem:[%s4533_s22 + $0x70] sm:$0xff] %v2045_v41 }
 0x488   : > { %v3592_v25 = vpop.f32.mrf.mxu0 }
 0x489   : > { %v2086_v54 = vpop.f32.mrf.mxu1 }
 0x48a   : > { %2379 = vst [vmem:[%s4533_s22 + $0xb8] sm:$0xff] %v2086_v54 }
 0x48b   : > { %v3597_v31 = vpop.f32.mrf.mxu1 }
 0x48d   : > { %v2089_v47 = vpop.f32.mrf.mxu1 }
 0x48e   : > { %2380 = vst [vmem:[%s4533_s22 + $0x100] sm:$0xff] %v2089_v47 }
 0x48f   : > { %v3598_v3 = vpop.f32.mrf.mxu1 }
 0x49a   : > { %v2130_v1 = vpop.f32.mrf.mxu0 }
 0x49b   : > { %2381 = vst [vmem:[%s4533_s22 + $0x30] sm:$0xff] %v2130_v1 }
 0x49c   : > { %v3603_v55 = vpop.f32.mrf.mxu0 }
 0x49e   : > { %v2133_v16 = vpop.f32.mrf.mxu0 }
 0x49f   : > { %2382 = vst [vmem:[%s4533_s22 + $0x78] sm:$0xff] %v2133_v16 }
 0x4a0   : > { %v3604_v62 = vpop.f32.mrf.mxu0 }
 0x4a1   : > { %v2174_v63 = vpop.f32.mrf.mxu1 }
 0x4a2   : > { %2383 = vst [vmem:[%s4533_s22 + $0xc0] sm:$0xff] %v2174_v63  ;;  %v2218_v26 = vpop.f32.mrf.mxu0 }
 0x4a3   : > { %2385 = vst [vmem:[%s4533_s22 + $0x38] sm:$0xff] %v2218_v26  ;;  %v3609_v50 = vpop.f32.mrf.mxu1 }
 0x4a4   : > { %v3615_v14 = vpop.f32.mrf.mxu0 }
 0x4a5   : > { %v2177_v30 = vpop.f32.mrf.mxu1 }
 0x4a6   : > { %2384 = vst [vmem:[%s4533_s22 + $0x108] sm:$0xff] %v2177_v30  ;;  %v2221_v52 = vpop.f32.mrf.mxu0 }
 0x4a7   : > { %2386 = vst [vmem:[%s4533_s22 + $0x80] sm:$0xff] %v2221_v52  ;;  %v3610_v57 = vpop.f32.mrf.mxu1 }
 0x4a8   : > { %v3616_v24 = vpop.f32.mrf.mxu0 }
 0x4a9   : > { %v2262_v4 = vpop.f32.mrf.mxu1 }
 0x4aa   : > { %2387 = vst [vmem:[%s4533_s22 + $0xc8] sm:$0xff] %v2262_v4  ;;  %v2306_v36 = vpop.f32.mrf.mxu0 }
 0x4ab   : > { %2389 = vst [vmem:[%s4533_s22 + $0x40] sm:$0xff] %v2306_v36  ;;  %v3621_v28 = vpop.f32.mrf.mxu1 }
 0x4ac   : > { %v3627_v35 = vpop.f32.mrf.mxu0 }
 0x4ad   : > { %v2265_v46 = vpop.f32.mrf.mxu1 }
 0x4ae   : > { %2388 = vst [vmem:[%s4533_s22 + $0x110] sm:$0xff] %v2265_v46  ;;  %v2309_v42 = vpop.f32.mrf.mxu0 }
 0x4af   : > { %2390 = vst [vmem:[%s4533_s22 + $0x88] sm:$0xff] %v2309_v42  ;;  %v3622_v49 = vpop.f32.mrf.mxu1 }
 0x4b0   : > { %v3628_v9 = vpop.f32.mrf.mxu0 }
 0x4b1   : > { %v2350_v29 = vpop.f32.mrf.mxu1 }
 0x4b2   : > { %2391 = vst [vmem:[%s4533_s22 + $0xd0] sm:$0xff] %v2350_v29  ;;  %v2431_v39 = vpop.f32.mrf.mxu0 }
 0x4b3   : > { %2727 = vst [vmem:[%s4505_s17 + $0x28] sm:$0xff] %v2431_v39  ;;  %v3633_v6 = vpop.f32.mrf.mxu1 }
 0x4b4   : > { %v3639_v58 = vpop.f32.mrf.mxu0 }
 0x4b5   : > { %v2353_v19 = vpop.f32.mrf.mxu1 }
 0x4b6   : > { %2392 = vst [vmem:[%s4533_s22 + $0x118] sm:$0xff] %v2353_v19  ;;  %v2434_v2 = vpop.f32.mrf.mxu0 }
 0x4b7   : > { %v3634_v60 = vpop.f32.mrf.mxu1 }
 0x4b8   : > { %4058 = shalt.err (!%p4055_p5)
}
 0x4b9   : > { %s4059_s22 = scalar_lea.hbm %s5299_s24, 4608  ;;  %s4063_s26 = scalar_lea.hbm %s5442_s7, 18432 }
 0x4ba   : > { %p4060_p13 = scmp.ne.s32.totalorder %s5299_s24, %s4059_s22  ;;  %p4064_p9 = scmp.lt.s32.totalorder %s5299_s24, %s5442_s7 }
 0x4bb   : > { %p4065_p1 = scmp.lt.s32.totalorder %s4063_s26, %s4059_s22 }
 0x4bc   : > { %p4061_p7 = pnand %p4060_p13, %p5504_p2 }
 0x4bd   : > { %p4066_p8 = por %p4065_p1, %p4064_p9 }
 0x4be   : > { %p4062_p3 = pneg %p4061_p7 }
 0x4c0   : > { %p4067_p12 = pnand %p4066_p8, %p4062_p3 }
 0x4c2   : > { %4070 = shalt.err (!%p4067_p12)
}
 0x4c3   : > { %s4189_s11 = smov 1152   ;;  %s4190_s27 = smov 72   ;;  %v3640_v43 = vpop.f32.mrf.mxu0  ;;  %v2471_v56 = vpop.f32.mrf.mxu1 }
 0x4c4   : > { %3746 = dma.vmem_to_hbm [thread:$0]  (%p5504_p2), %s5301_s0, 4608, %s5299_s24, %s3078_s12, %s4189_s11, %s4189_s11, %s4190_s27  }
 0x4c5   : > { %2728 = vst [vmem:[%s4505_s17 + $0x70] sm:$0xff] %v2471_v56  ;;  %v2511_v48 = vpop.f32.mrf.mxu0  ;;  %v3645_v7 = vpop.f32.mrf.mxu1  ;;  %s3734_s18 = smul.u32 2304, %s4349_s25  ;;  %s3119_s1 = sshll.u32 %s4505_s17, 4  ;;  %s5345_s1 = int_to_ptr.vmem [resolvable:$true] %s3119_s1 }
 0x4c6   : > { %2729 = vst [vmem:[%s4505_s17 + $0x30] sm:$0xff] %v2511_v48  ;;  %s5351_s24 = scalar_lea.sflag [#allocation16], %s330_s30  ;;  %s4071_s12 = scalar_lea.vmem %s5345_s1, 2304 }
 0x4c7   : > { %v3651_v13 = vpop.f32.mrf.mxu0  ;;  %v2474_v10 = vpop.f32.mrf.mxu1  ;;  %s5343_s16 = scalar_lea.hbm %s5443_s8, %s3734_s18  ;;  %p4072_p11 = scmp.ne.s32.totalorder %s5345_s1, %s4071_s12 }
 0x4c8   : > { %s4191_s14 = smov [#allocation15]  }
 0x4c9   : > { %v2514_v11 = vpop.f32.mrf.mxu0  ;;  %v3646_v12 = vpop.f32.mrf.mxu1  ;;  %p4073_p0 = pnand %p4072_p11, %p5504_p2  ;;  %s4075_s13 = sshll.u32 %s4191_s14, 4  ;;  %s4076_s13 = int_to_ptr.vmem [resolvable:$false] %s4075_s13 }
 0x4ca   : > { %s4077_s19 = scalar_lea.vmem %s4076_s13, 4608  ;;  %p4078_p4 = scmp.lt.s32.totalorder %s5345_s1, %s4076_s13 }
 0x4cb   : > { %v3652_v15 = vpop.f32.mrf.mxu0  ;;  %v2551_v32 = vpop.f32.mrf.mxu1  ;;  %p4074_p10 = pneg %p4073_p0  ;;  %p4079_p6 = scmp.lt.s32.totalorder %s4077_s19, %s4071_s12 }
 0x4cc   : > { %2730 = vst [vmem:[%s4505_s17 + $0x78] sm:$0xff] %v2551_v32 }
 0x4cd   : > { %v2591_v17 = vpop.f32.mrf.mxu0  ;;  %v3657_v18 = vpop.f32.mrf.mxu1  ;;  %p4080_p5 = por %p4079_p6, %p4078_p4 }
 0x4ce   : > { %2731 = vst [vmem:[%s4505_s17 + $0x38] sm:$0xff] %v2591_v17 }
 0x4cf   : > { %v3663_v27 = vpop.f32.mrf.mxu0  ;;  %v2554_v33 = vpop.f32.mrf.mxu1  ;;  %p4081_p13 = pnand %p4080_p5, %p4074_p10 }
 0x4d1   : > { %v2594_v0 = vpop.f32.mrf.mxu0  ;;  %v3658_v38 = vpop.f32.mrf.mxu1 }
 0x4d3   : > { %v3664_v20 = vpop.f32.mrf.mxu0  ;;  %v2631_v37 = vpop.f32.mrf.mxu1 }
 0x4d4   : > { %2732 = vst [vmem:[%s4505_s17 + $0x80] sm:$0xff] %v2631_v37 }
 0x4d5   : > { %v2671_v8 = vpop.f32.mrf.mxu0  ;;  %v3669_v61 = vpop.f32.mrf.mxu1 }
 0x4d6   : > { %2733 = vst [vmem:[%s4505_s17 + $0x40] sm:$0xff] %v2671_v8 }
 0x4d7   : > { %v3675_v5 = vpop.f32.mrf.mxu0  ;;  %v2634_v23 = vpop.f32.mrf.mxu1 }
 0x4d9   : > { %v2674_v40 = vpop.f32.mrf.mxu0  ;;  %v3670_v34 = vpop.f32.mrf.mxu1 }
 0x4db   : > { %v3676_v45 = vpop.f32.mrf.mxu0  ;;  %v2711_v51 = vpop.f32.mrf.mxu1 }
 0x4dc   : > { %2734 = vst [vmem:[%s4505_s17 + $0x88] sm:$0xff] %v2711_v51 }
 0x4dd   : > { %v2773_v22 = vpop.f32.mrf.mxu0  ;;  %v3681_v59 = vpop.f32.mrf.mxu1 }
 0x4de   : > { %3069 = vst [vmem:[%s4510_s2 + $0x28] sm:$0xff] %v2773_v22 }
 0x4df   : > { %4084 = shalt.err (!%p4081_p13)
}
 0x4e0   : > { %s4085_s30 = scalar_lea.hbm %s5343_s16, 2304  ;;  %s4089_s22 = scalar_lea.hbm %s5443_s8, 9216 }
 0x4e1   : > { %p4086_p7 = scmp.ne.s32.totalorder %s5343_s16, %s4085_s30  ;;  %p4090_p1 = scmp.lt.s32.totalorder %s5343_s16, %s5443_s8 }
 0x4e2   : > { %p4091_p8 = scmp.lt.s32.totalorder %s4089_s22, %s4085_s30 }
 0x4e3   : > { %p4087_p3 = pnand %p4086_p7, %p5504_p2 }
 0x4e4   : > { %p4092_p12 = por %p4091_p8, %p4090_p1 }
 0x4e5   : > { %p4088_p9 = pneg %p4087_p3 }
 0x4e7   : > { %p4093_p11 = pnand %p4092_p12, %p4088_p9 }
 0x4e9   : > { %4096 = shalt.err (!%p4093_p11)
}
 0x4ea   : > { %3747 = dma.vmem_to_hbm [thread:$0]  (%p5504_p2), %s5345_s1, 2304, %s5343_s16, %s5351_s24, %s4189_s11, %s4189_s11, %s4190_s27   ;;  %v3687_v53 = vpop.f32.mrf.mxu0  ;;  %v2714_v21 = vpop.f32.mrf.mxu1 }
 0x4eb   : > { %s3136_s26 = sshll.u32 %s4510_s2, 4  ;;  %s5389_s1 = scalar_lea.hbm %s5444_s9, %s3734_s18  ;;  %s5391_s26 = int_to_ptr.vmem [resolvable:$true] %s3136_s26 }
 0x4ec   : > { %v2776_v44 = vpop.f32.mrf.mxu0  ;;  %v3682_v41 = vpop.f32.mrf.mxu1  ;;  %s4097_s0 = scalar_lea.vmem %s5391_s26, 2304  ;;  %s4192_s29 = smov [#allocation17]  }
 0x4ed   : > { %p4098_p0 = scmp.ne.s32.totalorder %s5391_s26, %s4097_s0  ;;  %s4101_s25 = sshll.u32 %s4192_s29, 4  ;;  %s4102_s25 = int_to_ptr.vmem [resolvable:$false] %s4101_s25 }
 0x4ee   : > { %v3688_v25 = vpop.f32.mrf.mxu0  ;;  %v2813_v54 = vpop.f32.mrf.mxu1  ;;  %s4103_s16 = scalar_lea.vmem %s4102_s25, 4608  ;;  %p4104_p6 = scmp.lt.s32.totalorder %s5391_s26, %s4102_s25 }
 0x4ef   : > { %3070 = vst [vmem:[%s4510_s2 + $0x70] sm:$0xff] %v2813_v54  ;;  %p4099_p10 = pnand %p4098_p0, %p5504_p2  ;;  %p4105_p5 = scmp.lt.s32.totalorder %s4103_s16, %s4097_s0 }
 0x4f0   : > { %v2853_v31 = vpop.f32.mrf.mxu0  ;;  %v3693_v47 = vpop.f32.mrf.mxu1 }
 0x4f1   : > { %3071 = vst [vmem:[%s4510_s2 + $0x30] sm:$0xff] %v2853_v31  ;;  %p4100_p4 = pneg %p4099_p10  ;;  %p4106_p13 = por %p4105_p5, %p4104_p6 }
 0x4f2   : > { %v3699_v3 = vpop.f32.mrf.mxu0  ;;  %v2816_v1 = vpop.f32.mrf.mxu1 }
 0x4f3   : > { %p4107_p7 = pnand %p4106_p13, %p4100_p4 }
 0x4f4   : > { %v2856_v55 = vpop.f32.mrf.mxu0  ;;  %v3694_v16 = vpop.f32.mrf.mxu1 }
 0x4f6   : > { %v3700_v62 = vpop.f32.mrf.mxu0  ;;  %v2893_v63 = vpop.f32.mrf.mxu1 }
 0x4f7   : > { %3072 = vst [vmem:[%s4510_s2 + $0x78] sm:$0xff] %v2893_v63 }
 0x4f8   : > { %v2933_v26 = vpop.f32.mrf.mxu0  ;;  %v3705_v50 = vpop.f32.mrf.mxu1 }
 0x4f9   : > { %3073 = vst [vmem:[%s4510_s2 + $0x38] sm:$0xff] %v2933_v26 }
 0x4fa   : > { %v3711_v14 = vpop.f32.mrf.mxu0  ;;  %v2896_v30 = vpop.f32.mrf.mxu1 }
 0x4fc   : > { %v2936_v52 = vpop.f32.mrf.mxu0  ;;  %v3706_v57 = vpop.f32.mrf.mxu1 }
 0x4fe   : > { %v3712_v24 = vpop.f32.mrf.mxu0  ;;  %v2973_v4 = vpop.f32.mrf.mxu1 }
 0x4ff   : > { %3074 = vst [vmem:[%s4510_s2 + $0x80] sm:$0xff] %v2973_v4 }
 0x500   : > { %v3013_v36 = vpop.f32.mrf.mxu0  ;;  %v3717_v28 = vpop.f32.mrf.mxu1 }
 0x501   : > { %3075 = vst [vmem:[%s4510_s2 + $0x40] sm:$0xff] %v3013_v36 }
 0x502   : > { %v3723_v35 = vpop.f32.mrf.mxu0  ;;  %v2976_v46 = vpop.f32.mrf.mxu1 }
 0x504   : > { %v3016_v42 = vpop.f32.mrf.mxu0  ;;  %v3718_v49 = vpop.f32.mrf.mxu1 }
 0x506   : > { %v3724_v9 = vpop.f32.mrf.mxu0  ;;  %v3053_v29 = vpop.f32.mrf.mxu1 }
 0x507   : > { %3076 = vst [vmem:[%s4510_s2 + $0x88] sm:$0xff] %v3053_v29 }
 0x508   : > { %v3729_v39 = vpop.f32.mrf.mxu1 }
 0x509   : > { %4110 = shalt.err (!%p4107_p7)
}
 0x50a   : > { %s4111_s2 = scalar_lea.hbm %s5389_s1, 2304  ;;  %s4115_s14 = scalar_lea.hbm %s5444_s9, 9216 }
 0x50b   : > { %p4112_p3 = scmp.ne.s32.totalorder %s5389_s1, %s4111_s2  ;;  %p4116_p8 = scmp.lt.s32.totalorder %s5389_s1, %s5444_s9 }
 0x50c   : > { %p4117_p12 = scmp.lt.s32.totalorder %s4115_s14, %s4111_s2 }
 0x50d   : > { %p4113_p9 = pnand %p4112_p3, %p5504_p2 }
 0x50e   : > { %p4118_p11 = por %p4117_p12, %p4116_p8 }
 0x50f   : > { %p4114_p1 = pneg %p4113_p9 }
 0x511   : > { %p4119_p0 = pnand %p4118_p11, %p4114_p1 }
 0x513   : > { %4122 = shalt.err (!%p4119_p0)
}
 0x514   : > { %3748 = dma.vmem_to_hbm [thread:$0]  (%p5504_p2), %s5391_s26, 2304, %s5389_s1, %s5351_s24, %s4189_s11, %s4189_s11, %s4190_s27   ;;  %v3056_v6 = vpop.f32.mrf.mxu1 }
 0x516   : > { %v3730_v58 = vpop.f32.mrf.mxu1 }
 0x517 PF: > { %s5505_s30 = sld [smem:[#allocation26_spill]] }
 0x518   : > { %s5506_s17 = sld [smem:[#allocation24_spill]] }
 0x519   : > { %s5507_s23 = sld [smem:[#allocation29_spill]] }
 0x51d   : > { %p3779_p10 = scmp.ge.s32.totalorder %s5505_s30, 2 }
 0x51e   : > { %s3151_s22 = sand.u32 1, %s5506_s17  }
 0x51f   : > { %p5508_p4 = scmp.ne.s32.totalorder %s5507_s23, 0  ;;  %s3152_s15 = scalar_lea.sflag [#allocation8], %s3151_s22 }
 0x521   : > { %p3767_p6 = pnand %p3779_p10, %p5508_p4 }
 0x523   : > { %p3768_p5 = pneg %p3767_p6 }
 0x525   : > { %4154 = dma.done.wait (%p3768_p5), %s3152_s15, 4608  }
 0x526   : > { %4156 = vsyncadd (%p3768_p5), %s3152_s15, 4294962688  ;;  %s5509_s10 = sadd.s32 4294967294, %s5505_s30  }
 0x527   : > { %s3160_s28 = sand.u32 1, %s5509_s10  }
 0x528   : > { %s3161_s4 = scalar_lea.sflag [#allocation16], %s3160_s28 }
 0x529   : > { %4158 = dma.done.wait (%p3768_p5), %s3161_s4, 4608  }
 0x52a   : > { %4160 = vsyncadd (%p3768_p5), %s3161_s4, 4294962688  ;;  %s5510_s22 = sld [smem:[#allocation27_spill]]  ;;  %s5513_s2 = smov %s4167_s20 }
 0x52b   : > { %s5511_s11 = sld [smem:[#allocation25_spill]] }
 0x52c   : > { %s5512_s21 = sld [smem:[#allocation28_spill]] }
 0x530   : > { %p42_p2 = scmp.ge.s32.totalorder %s5510_s22, 6  }
 0x531   : > { %s5514_s20 = smov %s5511_s11 }
 0x532   :  { %44 = sbr.rel (!%p42_p2) target bundleno = 37 (0x25), region = 141 }
 0x537   :  { %3175 = vsyncpa [#allocation7], 1 }
 0x538   :  { %3177 = vsyncpa [#allocation7 + $0x1], 1 }
 0x539   :  { %3178 = vsyncpa [#allocation10], 1 }
 0x53a   :  { %3180 = vsyncpa [#allocation10 + $0x1], 1 }
 0x53b   :  { %3181 = vsyncpa [#allocation13], 1 }
 0x53c   :  { %3182 = vsyncpa [#allocation8], 1 }
 0x53d   :  { %3184 = vsyncpa [#allocation8 + $0x1], 1 }
 0x53e   :  { %3185 = vsyncpa [#allocation16], 1 }
 0x53f   :  { %3187 = vsyncpa [#allocation16 + $0x1], 1 }

</bundles_post_ra>
